<compile_context>
chip_gen: v7x
topology: tpu7x:2x2x1
jax: 0.10.0
libtpu: 0.0.40
codegen_flags: <defaults>
</compile_context>

<pallas_src>
import functools

import jax
import jax.numpy as jnp
from jax import lax
from jax.experimental import pallas as pl
from jax.experimental.pallas import tpu as pltpu


def _round_up(x, m):
    return ((x + m - 1) // m) * m


def _encoder_lstm_kernel(x_hbm_ref, wih_ref, whh_ref, b_ref,
                         h_ref, c_ref,
                         act_ref, gx_ref):
    """One LSTM layer per grid step; grid axis = layer index (sequential).

    x_hbm_ref : (seq, Bp, Kp)       padded embedded tokens, left in HBM (pl.ANY)
    wih_ref   : (Kp, 4*Hp)          this layer's input->hidden weights (pre-packed)
    whh_ref   : (Hp, 4*Hp)          this layer's hidden->hidden weights
    b_ref     : (1, 4*Hp)           combined bias b_ih + b_hh (per-gate padded)
    h_ref     : (Bp, Hp)            output block: final hidden state of this layer
    c_ref     : (Bp, Hp)            output block: final cell state of this layer
    act_ref   : (seq, Bp, Kp)       VMEM scratch: current layer input / next layer input
    gx_ref    : (2*T_c, Bp, 4*Hp)   VMEM scratch: double-buffered chunked x @ W_ih + b
    """
    layer = pl.program_id(0)
    seq, batch, kp = act_ref.shape
    hid = h_ref.shape[-1]
    t_c = gx_ref.shape[0] // 2                 # static chunk length

    # Layer 0: pull the padded embedded tokens HBM -> VMEM exactly once.
    @pl.when(layer == 0)
    def _():
        pltpu.sync_copy(x_hbm_ref, act_ref)

    # If the padded input width exceeds the hidden width, layers >= 1 only
    # write the first `hid` feature columns; zero the stale embedding tail
    # once at the layer-0 boundary (lane-aligned: hid, kp multiples of 128).
    if kp > hid:
        @pl.when(layer == 1)
        def _():
            act_ref[:, :, hid:] = jnp.zeros((seq, batch, kp - hid), jnp.float32)

    chunk_starts = list(range(0, seq, t_c))

    def project(chunk_idx, slot):
        # Hoisted input projection for one chunk of timesteps: a single
        # (len*Bp, Kp) @ (Kp, 4*Hp) matmul, off the serial critical path.
        start = chunk_starts[chunk_idx]
        length = min(t_c, seq - start)
        a = act_ref[start:start + length].reshape(length * batch, kp)
        g = jnp.dot(a, wih_ref[...], preferred_element_type=jnp.float32) + b_ref[...]
        gx_ref[slot * t_c:slot * t_c + length] = g.reshape(length, batch, 4 * hid)

    # Prime slot 0; for chunk c, first issue chunk c+1's projection into the
    # other slot (no WAR hazard -> scheduler free to overlap), then run the
    # serial recurrence over chunk c.
    project(0, 0)
    h = jnp.zeros((batch, hid), jnp.float32)
    c = jnp.zeros((batch, hid), jnp.float32)

    for ci, start in enumerate(chunk_starts):
        slot = ci % 2
        if ci + 1 < len(chunk_starts):
            project(ci + 1, (ci + 1) % 2)
        length = min(t_c, seq - start)
        base = slot * t_c

        def step(t, carry, start=start, base=base):
            h, c = carry
            # TODO(synk): W_hh re-streamed per step; see MXU-residency TODO above.
            gates = gx_ref[base + t] + jnp.dot(
                h, whh_ref[...], preferred_element_type=jnp.float32)
            # PyTorch gate order i, f, g, o; hid is a multiple of 128 so every
            # slice is lane-aligned (no intra-vreg shuffles).
            i_g = jax.nn.sigmoid(gates[:, 0 * hid:1 * hid])
            f_g = jax.nn.sigmoid(gates[:, 1 * hid:2 * hid])
            g_g = jnp.tanh(gates[:, 2 * hid:3 * hid])
            o_g = jax.nn.sigmoid(gates[:, 3 * hid:4 * hid])
            c_new = f_g * c + i_g * g_g
            h_new = o_g * jnp.tanh(c_new)
            # Lane-aligned (partial) store: hand h_new to the next layer
            # through the resident activation scratch (no zero-concatenate).
            if kp == hid:
                act_ref[start + t] = h_new
            else:
                act_ref[start + t, :, 0:hid] = h_new
            return (h_new, c_new)

        # Capped unroll: keeps cross-step MXU/EUP overlap visible to the LLO
        # scheduler without blowing up code size / vreg pressure at long seq.
        if length <= 8:
            unroll = length
        elif length % 4 == 0:
            unroll = 4
        else:
            unroll = 1
        h, c = lax.fori_loop(0, length, step, (h, c), unroll=unroll)

    h_ref[...] = h
    c_ref[...] = c


def encoder_forward(src, params, *, emb_dim, hid_dim):
    """Equivalent of Encoder.forward(src) -> (hidden, cell_state) (eval mode)."""
    emb_table = params["embedding"]
    # TODO(synk): self.dropout / rnn inter-layer dropout are identity (eval mode).
    embedded = emb_table[src].astype(jnp.float32)        # (seq, batch, emb_dim)

    seq, batch = src.shape
    n_layers, k_pad, four_hid_pad = params["wih"].shape
    hid_pad = four_hid_pad // 4
    batch_pad = _round_up(batch, 8)

    x = jnp.pad(embedded,
                ((0, 0), (0, batch_pad - batch), (0, k_pad - emb_dim)))

    # Chunk length for the hoisted projection: keep the MXU row-filled
    # (t_c * batch_pad >= 256 when seq allows) while capping the gx scratch.
    t_c = max(1, min(seq, max(8, 256 // batch_pad)))

    # Explicit VMEM budget: activations + double-buffered gx chunk +
    # double-buffered per-layer weights + double-buffered outputs.
    f32b = 4
    needed = (seq * batch_pad * k_pad * f32b
              + 2 * t_c * batch_pad * 4 * hid_pad * f32b
              + 2 * (k_pad + hid_pad + 1) * 4 * hid_pad * f32b
              + 2 * 2 * batch_pad * hid_pad * f32b)
    vmem_limit = int(min(64 * 2**20, max(32 * 2**20, 2 * needed)))

    grid_spec = pltpu.PrefetchScalarGridSpec(
        num_scalar_prefetch=0,
        grid=(n_layers,),
        in_specs=[
            # Embedded tokens stay in HBM; DMA'd into VMEM once at layer 0.
            pl.BlockSpec(memory_space=pl.ANY),
            # Per-layer weights / bias (leading layer dim squeezed in-kernel).
            pl.BlockSpec((None, k_pad, 4 * hid_pad), lambda l: (l, 0, 0)),
            pl.BlockSpec((None, hid_pad, 4 * hid_pad), lambda l: (l, 0, 0)),
            pl.BlockSpec((None, 1, 4 * hid_pad), lambda l: (l, 0, 0)),
        ],
        out_specs=(
            pl.BlockSpec((None, batch_pad, hid_pad), lambda l: (l, 0, 0)),
            pl.BlockSpec((None, batch_pad, hid_pad), lambda l: (l, 0, 0)),
        ),
        scratch_shapes=[
            pltpu.VMEM((seq, batch_pad, k_pad), jnp.float32),            # activations
            pltpu.VMEM((2 * t_c, batch_pad, 4 * hid_pad), jnp.float32),  # gx chunks
        ],
    )

    h_out, c_out = pl.pallas_call(
        _encoder_lstm_kernel,
        out_shape=(
            jax.ShapeDtypeStruct((n_layers, batch_pad, hid_pad), jnp.float32),
            jax.ShapeDtypeStruct((n_layers, batch_pad, hid_pad), jnp.float32),
        ),
        grid_spec=grid_spec,
        compiler_params=pltpu.CompilerParams(
            dimension_semantics=("arbitrary",),   # layers are sequentially dependent
            vmem_limit_bytes=vmem_limit,
        ),
    )(x, params["wih"], params["whh"], params["bias"])

    hidden = h_out[:, :batch, :hid_dim]
    cell_state = c_out[:, :batch, :hid_dim]
    return hidden, cell_state


def _pack_w(w, in_pad, hid_pad):
    """(4*hid, in_dim) PyTorch weight -> (in_pad, 4*hid_pad) transposed, per-gate padded."""
    four_h, in_dim = w.shape
    hid = four_h // 4
    wt = jnp.transpose(w).reshape(in_dim, 4, hid)
    wt = jnp.pad(wt, ((0, in_pad - in_dim), (0, 0), (0, hid_pad - hid)))
    return wt.reshape(in_pad, 4 * hid_pad)


def _pack_b(b_ih, b_hh, hid_pad):
    b = (b_ih + b_hh).reshape(4, -1)
    hid = b.shape[1]
    b = jnp.pad(b, ((0, 0), (0, hid_pad - hid)))
    return b.reshape(1, 4 * hid_pad)


def init_params(key, input_dim, emb_dim, hid_dim, n_layers):
    keys = jax.random.split(key, 1 + 4 * n_layers)
    # weights_matrix analogue: deterministic embedding table.
    embedding = jax.random.normal(keys[0], (input_dim, emb_dim), jnp.float32) * 0.1

    hid_pad = _round_up(hid_dim, 128)                 # lane-aligned gates
    k_pad = max(_round_up(emb_dim, 128), hid_pad)     # common padded input width

    raw_layers = []
    wih_l, whh_l, b_l = [], [], []
    k_idx = 1
    for l in range(n_layers):
        in_dim = emb_dim if l == 0 else hid_dim
        w_ih = jax.random.normal(keys[k_idx], (4 * hid_dim, in_dim), jnp.float32) * 0.1
        w_hh = jax.random.normal(keys[k_idx + 1], (4 * hid_dim, hid_dim), jnp.float32) * 0.1
        b_ih = jax.random.normal(keys[k_idx + 2], (4 * hid_dim,), jnp.float32) * 0.1
        b_hh = jax.random.normal(keys[k_idx + 3], (4 * hid_dim,), jnp.float32) * 0.1
        k_idx += 4
        raw_layers.append({"w_ih": w_ih, "w_hh": w_hh, "b_ih": b_ih, "b_hh": b_hh})
        # One-time preprocessing (transpose + per-gate pad + bias combine) so the
        # steady-state forward does zero weight re-layout work.  Kept fp32 to
        # match the PyTorch module's numerics (bf16 storage would halve weight
        # DMA / VMEM but change results).
        wih_l.append(_pack_w(w_ih, k_pad, hid_pad))
        whh_l.append(_pack_w(w_hh, hid_pad, hid_pad))
        b_l.append(_pack_b(b_ih, b_hh, hid_pad))

    params = {
        "embedding": embedding,
        "wih": jnp.stack(wih_l, 0),    # (n_layers, k_pad, 4*hid_pad)
        "whh": jnp.stack(whh_l, 0),    # (n_layers, hid_pad, 4*hid_pad)
        "bias": jnp.stack(b_l, 0),     # (n_layers, 1, 4*hid_pad)
    }
    return params, raw_layers


def _reference_forward(src, embedding, raw_layers, hid_dim):
    """Pure-JAX reference matching nn.LSTM (eval-mode) semantics."""
    x = embedding[src].astype(jnp.float32)
    seq, batch, _ = x.shape
    hs, cs = [], []
    for lyr in raw_layers:
        h = jnp.zeros((batch, hid_dim), jnp.float32)
        c = jnp.zeros((batch, hid_dim), jnp.float32)
        ys = []
        for t in range(seq):
            gates = (x[t] @ lyr["w_ih"].T + h @ lyr["w_hh"].T
                     + lyr["b_ih"] + lyr["b_hh"])
            i = jax.nn.sigmoid(gates[:, 0 * hid_dim:1 * hid_dim])
            f = jax.nn.sigmoid(gates[:, 1 * hid_dim:2 * hid_dim])
            g = jnp.tanh(gates[:, 2 * hid_dim:3 * hid_dim])
            o = jax.nn.sigmoid(gates[:, 3 * hid_dim:4 * hid_dim])
            c = f * c + i * g
            h = o * jnp.tanh(c)
            ys.append(h)
        x = jnp.stack(ys, 0)
        hs.append(h)
        cs.append(c)
    return jnp.stack(hs, 0), jnp.stack(cs, 0)


if __name__ == "__main__":
    # Small shapes consistent with the module's forward:
    #   src: (seq_len=8, batch=2) token ids in [0, input_dim)
    input_dim = 50   # vocab size
    emb_dim = 32
    hid_dim = 32
    n_layers = 2
    seq_len = 8
    batch = 2

    key = jax.random.PRNGKey(0)
    k_params, k_src = jax.random.split(key)
    params, raw_layers = init_params(k_params, input_dim, emb_dim, hid_dim, n_layers)
    src = jax.random.randint(k_src, (seq_len, batch), 0, input_dim, dtype=jnp.int32)

    fwd = jax.jit(functools.partial(encoder_forward, params=params,
                                    emb_dim=emb_dim, hid_dim=hid_dim))
    hidden, cell_state = fwd(src)
    jax.block_until_ready((hidden, cell_state))

    assert hidden.shape == (n_layers, batch, hid_dim)
    assert cell_state.shape == (n_layers, batch, hid_dim)

    # Numerical check against the pure-JAX reference (same f32 math).
    h_ref_val, c_ref_val = _reference_forward(src, params["embedding"],
                                              raw_layers, hid_dim)
    assert float(jnp.max(jnp.abs(hidden - h_ref_val))) < 2e-5
    assert float(jnp.max(jnp.abs(cell_state - c_ref_val))) < 2e-5

    print("KERNEL_OK")
</pallas_src>

<mosaic_0001>
module attributes {stable_mosaic.version = 11 : i64} {
  func.func @_encoder_lstm_kernel(%arg0: i32, %arg1: memref<8x8x128xf32, #tpu.memory_space<any>>, %arg2: memref<1x128x512xf32, #tpu.memory_space<vmem>>, %arg3: memref<1x128x512xf32, #tpu.memory_space<vmem>>, %arg4: memref<1x1x512xf32, #tpu.memory_space<vmem>>, %arg5: memref<1x8x128xf32, #tpu.memory_space<vmem>>, %arg6: memref<1x8x128xf32, #tpu.memory_space<vmem>>, %arg7: memref<8x8x128xf32, #tpu.memory_space<vmem>>, %arg8: memref<16x8x512xf32, #tpu.memory_space<vmem>>) attributes {dimension_semantics = [#tpu.dimension_semantics<arbitrary>], iteration_bounds = array<i64: 2>, scalar_prefetch = 0 : i64, scratch_operands = 2 : i64, tpu.core_type = #tpu.core_type<tc>, window_params = [{}, {transform_indices = @transform_1, window_bounds = array<i64: 1, 128, 512>}, {transform_indices = @transform_2, window_bounds = array<i64: 1, 128, 512>}, {transform_indices = @transform_3, window_bounds = array<i64: 1, 1, 512>}, {transform_indices = @transform_4, window_bounds = array<i64: 1, 8, 128>}, {transform_indices = @transform_5, window_bounds = array<i64: 1, 8, 128>}]} {
    %c0_i32 = arith.constant 0 : i32
    %0 = arith.cmpi eq, %arg0, %c0_i32 : i32
    %1 = arith.extui %0 : i1 to i32
    %c0_i32_0 = arith.constant 0 : i32
    %2 = arith.cmpi ne, %1, %c0_i32_0 : i32
    scf.if %2 {
      "tpu.region"() ({
        %326 = tpu.sem_alloc : memref<!tpu.dma_semaphore, #tpu.memory_space<semaphore_mem>>
        tpu.enqueue_dma source(%arg1 : memref<8x8x128xf32, #tpu.memory_space<any>>) target(%arg7 : memref<8x8x128xf32, #tpu.memory_space<vmem>>) target_semaphore(%326 : memref<!tpu.dma_semaphore, #tpu.memory_space<semaphore_mem>>)
        tpu.wait_dma2 semaphore(%326 : memref<!tpu.dma_semaphore, #tpu.memory_space<semaphore_mem>>) src(%arg1 : memref<8x8x128xf32, #tpu.memory_space<any>>) dst(%arg7 : memref<8x8x128xf32, #tpu.memory_space<vmem>>)
        tpu.yield
      }) : () -> ()
    } else {
    }
    %c0 = arith.constant 0 : index
    %c0_1 = arith.constant 0 : index
    %c0_2 = arith.constant 0 : index
    %3 = vector.load %arg7[%c0, %c0_1, %c0_2] : memref<8x8x128xf32, #tpu.memory_space<vmem>>, vector<8x8x128xf32>
    %4 = vector.shape_cast %3 : vector<8x8x128xf32> to vector<64x128xf32>
    %c0_3 = arith.constant 0 : index
    %c0_4 = arith.constant 0 : index
    %c0_5 = arith.constant 0 : index
    %5 = vector.load %arg2[%c0_3, %c0_4, %c0_5] : memref<1x128x512xf32, #tpu.memory_space<vmem>>, vector<1x128x512xf32>
    %6 = vector.shape_cast %5 : vector<1x128x512xf32> to vector<128x512xf32>
    %cst = arith.constant dense<0.000000e+00> : vector<64x512xf32>
    %7 = tpu.matmul %4, %6, %cst {dimension_numbers = #tpu.dot_dimension_numbers<[1], [0], [0], [1], [0, 0, 1, 1], [], []>} : vector<64x128xf32>, vector<128x512xf32>, vector<64x512xf32> -> vector<64x512xf32>
    %c0_6 = arith.constant 0 : index
    %c0_7 = arith.constant 0 : index
    %c0_8 = arith.constant 0 : index
    %8 = vector.load %arg4[%c0_6, %c0_7, %c0_8] : memref<1x1x512xf32, #tpu.memory_space<vmem>>, vector<1x1x512xf32>
    %9 = vector.shape_cast %8 : vector<1x1x512xf32> to vector<1x512xf32>
    %10 = vector.broadcast %9 : vector<1x512xf32> to vector<64x512xf32>
    %11 = arith.addf %7, %10 : vector<64x512xf32>
    %12 = vector.shape_cast %11 : vector<64x512xf32> to vector<8x8x512xf32>
    %c0_9 = arith.constant 0 : index
    %c0_10 = arith.constant 0 : index
    %c0_11 = arith.constant 0 : index
    %13 = vector.load %arg8[%c0_9, %c0_10, %c0_11] : memref<16x8x512xf32, #tpu.memory_space<vmem>>, vector<8x8x512xf32>
    tpu.vector_store %arg8[%c0_9, %c0_10, %c0_11], %12 {strides = array<i32>} : memref<16x8x512xf32, #tpu.memory_space<vmem>>, vector<8x8x512xf32>,
    %cst_12 = arith.constant 0.000000e+00 : f32
    %14 = vector.broadcast %cst_12 : f32 to vector<8x128xf32>
    %cst_13 = arith.constant 0.000000e+00 : f32
    %15 = vector.broadcast %cst_13 : f32 to vector<8x128xf32>
    %c0_i32_14 = arith.constant 0 : i32
    %c0_i32_15 = arith.constant 0 : i32
    %16 = arith.addi %c0_i32_15, %c0_i32_14 : i32
    %17 = arith.index_cast %16 : i32 to index
    %c0_16 = arith.constant 0 : index
    %c0_17 = arith.constant 0 : index
    %18 = vector.load %arg8[%17, %c0_16, %c0_17] : memref<16x8x512xf32, #tpu.memory_space<vmem>>, vector<1x8x512xf32>
    %19 = vector.shape_cast %18 : vector<1x8x512xf32> to vector<8x512xf32>
    %c0_18 = arith.constant 0 : index
    %c0_19 = arith.constant 0 : index
    %c0_20 = arith.constant 0 : index
    %20 = vector.load %arg3[%c0_18, %c0_19, %c0_20] : memref<1x128x512xf32, #tpu.memory_space<vmem>>, vector<1x128x512xf32>
    %21 = vector.shape_cast %20 : vector<1x128x512xf32> to vector<128x512xf32>
    %cst_21 = arith.constant dense<0.000000e+00> : vector<8x512xf32>
    %22 = tpu.matmul %14, %21, %cst_21 {dimension_numbers = #tpu.dot_dimension_numbers<[1], [0], [0], [1], [0, 0, 1, 1], [], []>} : vector<8x128xf32>, vector<128x512xf32>, vector<8x512xf32> -> vector<8x512xf32>
    %23 = arith.addf %19, %22 : vector<8x512xf32>
    %24 = vector.extract_strided_slice %23 {offsets = [0, 0], sizes = [8, 128], strides = [1, 1]} : vector<8x512xf32> to vector<8x128xf32>
    %25 = arith.negf %24 : vector<8x128xf32>
    %26 = math.exp %25 : vector<8x128xf32>
    %cst_22 = arith.constant 1.000000e+00 : f32
    %27 = vector.broadcast %cst_22 : f32 to vector<8x128xf32>
    %28 = arith.addf %27, %26 : vector<8x128xf32>
    %29 = arith.divf %27, %28 : vector<8x128xf32>
    %30 = vector.extract_strided_slice %23 {offsets = [0, 128], sizes = [8, 128], strides = [1, 1]} : vector<8x512xf32> to vector<8x128xf32>
    %31 = arith.negf %30 : vector<8x128xf32>
    %32 = math.exp %31 : vector<8x128xf32>
    %cst_23 = arith.constant 1.000000e+00 : f32
    %33 = vector.broadcast %cst_23 : f32 to vector<8x128xf32>
    %34 = arith.addf %33, %32 : vector<8x128xf32>
    %35 = arith.divf %33, %34 : vector<8x128xf32>
    %36 = vector.extract_strided_slice %23 {offsets = [0, 256], sizes = [8, 128], strides = [1, 1]} : vector<8x512xf32> to vector<8x128xf32>
    %37 = math.tanh %36 : vector<8x128xf32>
    %38 = vector.extract_strided_slice %23 {offsets = [0, 384], sizes = [8, 128], strides = [1, 1]} : vector<8x512xf32> to vector<8x128xf32>
    %39 = arith.negf %38 : vector<8x128xf32>
    %40 = math.exp %39 : vector<8x128xf32>
    %cst_24 = arith.constant 1.000000e+00 : f32
    %41 = vector.broadcast %cst_24 : f32 to vector<8x128xf32>
    %42 = arith.addf %41, %40 : vector<8x128xf32>
    %43 = arith.divf %41, %42 : vector<8x128xf32>
    %44 = arith.mulf %35, %15 : vector<8x128xf32>
    %45 = arith.mulf %29, %37 : vector<8x128xf32>
    %46 = arith.addf %44, %45 : vector<8x128xf32>
    %47 = math.tanh %46 : vector<8x128xf32>
    %48 = arith.mulf %43, %47 : vector<8x128xf32>
    %c0_i32_25 = arith.constant 0 : i32
    %49 = arith.addi %c0_i32_25, %c0_i32_14 : i32
    %50 = arith.index_cast %49 : i32 to index
    %c0_26 = arith.constant 0 : index
    %c0_27 = arith.constant 0 : index
    %51 = vector.load %arg7[%50, %c0_26, %c0_27] : memref<8x8x128xf32, #tpu.memory_space<vmem>>, vector<1x8x128xf32>
    %52 = vector.shape_cast %51 : vector<1x8x128xf32> to vector<8x128xf32>
    %53 = vector.shape_cast %48 : vector<8x128xf32> to vector<1x8x128xf32>
    tpu.vector_store %arg7[%50, %c0_26, %c0_27], %53 {strides = array<i32>} : memref<8x8x128xf32, #tpu.memory_space<vmem>>, vector<1x8x128xf32>,
    %c1_i32 = arith.constant 1 : i32
    %c0_i32_28 = arith.constant 0 : i32
    %54 = arith.addi %c0_i32_28, %c1_i32 : i32
    %55 = arith.index_cast %54 : i32 to index
    %c0_29 = arith.constant 0 : index
    %c0_30 = arith.constant 0 : index
    %56 = vector.load %arg8[%55, %c0_29, %c0_30] : memref<16x8x512xf32, #tpu.memory_space<vmem>>, vector<1x8x512xf32>
    %57 = vector.shape_cast %56 : vector<1x8x512xf32> to vector<8x512xf32>
    %c0_31 = arith.constant 0 : index
    %c0_32 = arith.constant 0 : index
    %c0_33 = arith.constant 0 : index
    %58 = vector.load %arg3[%c0_31, %c0_32, %c0_33] : memref<1x128x512xf32, #tpu.memory_space<vmem>>, vector<1x128x512xf32>
    %59 = vector.shape_cast %58 : vector<1x128x512xf32> to vector<128x512xf32>
    %cst_34 = arith.constant dense<0.000000e+00> : vector<8x512xf32>
    %60 = tpu.matmul %48, %59, %cst_34 {dimension_numbers = #tpu.dot_dimension_numbers<[1], [0], [0], [1], [0, 0, 1, 1], [], []>} : vector<8x128xf32>, vector<128x512xf32>, vector<8x512xf32> -> vector<8x512xf32>
    %61 = arith.addf %57, %60 : vector<8x512xf32>
    %62 = vector.extract_strided_slice %61 {offsets = [0, 0], sizes = [8, 128], strides = [1, 1]} : vector<8x512xf32> to vector<8x128xf32>
    %63 = arith.negf %62 : vector<8x128xf32>
    %64 = math.exp %63 : vector<8x128xf32>
    %cst_35 = arith.constant 1.000000e+00 : f32
    %65 = vector.broadcast %cst_35 : f32 to vector<8x128xf32>
    %66 = arith.addf %65, %64 : vector<8x128xf32>
    %67 = arith.divf %65, %66 : vector<8x128xf32>
    %68 = vector.extract_strided_slice %61 {offsets = [0, 128], sizes = [8, 128], strides = [1, 1]} : vector<8x512xf32> to vector<8x128xf32>
    %69 = arith.negf %68 : vector<8x128xf32>
    %70 = math.exp %69 : vector<8x128xf32>
    %cst_36 = arith.constant 1.000000e+00 : f32
    %71 = vector.broadcast %cst_36 : f32 to vector<8x128xf32>
    %72 = arith.addf %71, %70 : vector<8x128xf32>
    %73 = arith.divf %71, %72 : vector<8x128xf32>
    %74 = vector.extract_strided_slice %61 {offsets = [0, 256], sizes = [8, 128], strides = [1, 1]} : vector<8x512xf32> to vector<8x128xf32>
    %75 = math.tanh %74 : vector<8x128xf32>
    %76 = vector.extract_strided_slice %61 {offsets = [0, 384], sizes = [8, 128], strides = [1, 1]} : vector<8x512xf32> to vector<8x128xf32>
    %77 = arith.negf %76 : vector<8x128xf32>
    %78 = math.exp %77 : vector<8x128xf32>
    %cst_37 = arith.constant 1.000000e+00 : f32
    %79 = vector.broadcast %cst_37 : f32 to vector<8x128xf32>
    %80 = arith.addf %79, %78 : vector<8x128xf32>
    %81 = arith.divf %79, %80 : vector<8x128xf32>
    %82 = arith.mulf %73, %46 : vector<8x128xf32>
    %83 = arith.mulf %67, %75 : vector<8x128xf32>
    %84 = arith.addf %82, %83 : vector<8x128xf32>
    %85 = math.tanh %84 : vector<8x128xf32>
    %86 = arith.mulf %81, %85 : vector<8x128xf32>
    %c0_i32_38 = arith.constant 0 : i32
    %87 = arith.addi %c0_i32_38, %c1_i32 : i32
    %88 = arith.index_cast %87 : i32 to index
    %c0_39 = arith.constant 0 : index
    %c0_40 = arith.constant 0 : index
    %89 = vector.load %arg7[%88, %c0_39, %c0_40] : memref<8x8x128xf32, #tpu.memory_space<vmem>>, vector<1x8x128xf32>
    %90 = vector.shape_cast %89 : vector<1x8x128xf32> to vector<8x128xf32>
    %91 = vector.shape_cast %86 : vector<8x128xf32> to vector<1x8x128xf32>
    tpu.vector_store %arg7[%88, %c0_39, %c0_40], %91 {strides = array<i32>} : memref<8x8x128xf32, #tpu.memory_space<vmem>>, vector<1x8x128xf32>,
    %c2_i32 = arith.constant 2 : i32
    %c0_i32_41 = arith.constant 0 : i32
    %92 = arith.addi %c0_i32_41, %c2_i32 : i32
    %93 = arith.index_cast %92 : i32 to index
    %c0_42 = arith.constant 0 : index
    %c0_43 = arith.constant 0 : index
    %94 = vector.load %arg8[%93, %c0_42, %c0_43] : memref<16x8x512xf32, #tpu.memory_space<vmem>>, vector<1x8x512xf32>
    %95 = vector.shape_cast %94 : vector<1x8x512xf32> to vector<8x512xf32>
    %c0_44 = arith.constant 0 : index
    %c0_45 = arith.constant 0 : index
    %c0_46 = arith.constant 0 : index
    %96 = vector.load %arg3[%c0_44, %c0_45, %c0_46] : memref<1x128x512xf32, #tpu.memory_space<vmem>>, vector<1x128x512xf32>
    %97 = vector.shape_cast %96 : vector<1x128x512xf32> to vector<128x512xf32>
    %cst_47 = arith.constant dense<0.000000e+00> : vector<8x512xf32>
    %98 = tpu.matmul %86, %97, %cst_47 {dimension_numbers = #tpu.dot_dimension_numbers<[1], [0], [0], [1], [0, 0, 1, 1], [], []>} : vector<8x128xf32>, vector<128x512xf32>, vector<8x512xf32> -> vector<8x512xf32>
    %99 = arith.addf %95, %98 : vector<8x512xf32>
    %100 = vector.extract_strided_slice %99 {offsets = [0, 0], sizes = [8, 128], strides = [1, 1]} : vector<8x512xf32> to vector<8x128xf32>
    %101 = arith.negf %100 : vector<8x128xf32>
    %102 = math.exp %101 : vector<8x128xf32>
    %cst_48 = arith.constant 1.000000e+00 : f32
    %103 = vector.broadcast %cst_48 : f32 to vector<8x128xf32>
    %104 = arith.addf %103, %102 : vector<8x128xf32>
    %105 = arith.divf %103, %104 : vector<8x128xf32>
    %106 = vector.extract_strided_slice %99 {offsets = [0, 128], sizes = [8, 128], strides = [1, 1]} : vector<8x512xf32> to vector<8x128xf32>
    %107 = arith.negf %106 : vector<8x128xf32>
    %108 = math.exp %107 : vector<8x128xf32>
    %cst_49 = arith.constant 1.000000e+00 : f32
    %109 = vector.broadcast %cst_49 : f32 to vector<8x128xf32>
    %110 = arith.addf %109, %108 : vector<8x128xf32>
    %111 = arith.divf %109, %110 : vector<8x128xf32>
    %112 = vector.extract_strided_slice %99 {offsets = [0, 256], sizes = [8, 128], strides = [1, 1]} : vector<8x512xf32> to vector<8x128xf32>
    %113 = math.tanh %112 : vector<8x128xf32>
    %114 = vector.extract_strided_slice %99 {offsets = [0, 384], sizes = [8, 128], strides = [1, 1]} : vector<8x512xf32> to vector<8x128xf32>
    %115 = arith.negf %114 : vector<8x128xf32>
    %116 = math.exp %115 : vector<8x128xf32>
    %cst_50 = arith.constant 1.000000e+00 : f32
    %117 = vector.broadcast %cst_50 : f32 to vector<8x128xf32>
    %118 = arith.addf %117, %116 : vector<8x128xf32>
    %119 = arith.divf %117, %118 : vector<8x128xf32>
    %120 = arith.mulf %111, %84 : vector<8x128xf32>
    %121 = arith.mulf %105, %113 : vector<8x128xf32>
    %122 = arith.addf %120, %121 : vector<8x128xf32>
    %123 = math.tanh %122 : vector<8x128xf32>
    %124 = arith.mulf %119, %123 : vector<8x128xf32>
    %c0_i32_51 = arith.constant 0 : i32
    %125 = arith.addi %c0_i32_51, %c2_i32 : i32
    %126 = arith.index_cast %125 : i32 to index
    %c0_52 = arith.constant 0 : index
    %c0_53 = arith.constant 0 : index
    %127 = vector.load %arg7[%126, %c0_52, %c0_53] : memref<8x8x128xf32, #tpu.memory_space<vmem>>, vector<1x8x128xf32>
    %128 = vector.shape_cast %127 : vector<1x8x128xf32> to vector<8x128xf32>
    %129 = vector.shape_cast %124 : vector<8x128xf32> to vector<1x8x128xf32>
    tpu.vector_store %arg7[%126, %c0_52, %c0_53], %129 {strides = array<i32>} : memref<8x8x128xf32, #tpu.memory_space<vmem>>, vector<1x8x128xf32>,
    %c3_i32 = arith.constant 3 : i32
    %c0_i32_54 = arith.constant 0 : i32
    %130 = arith.addi %c0_i32_54, %c3_i32 : i32
    %131 = arith.index_cast %130 : i32 to index
    %c0_55 = arith.constant 0 : index
    %c0_56 = arith.constant 0 : index
    %132 = vector.load %arg8[%131, %c0_55, %c0_56] : memref<16x8x512xf32, #tpu.memory_space<vmem>>, vector<1x8x512xf32>
    %133 = vector.shape_cast %132 : vector<1x8x512xf32> to vector<8x512xf32>
    %c0_57 = arith.constant 0 : index
    %c0_58 = arith.constant 0 : index
    %c0_59 = arith.constant 0 : index
    %134 = vector.load %arg3[%c0_57, %c0_58, %c0_59] : memref<1x128x512xf32, #tpu.memory_space<vmem>>, vector<1x128x512xf32>
    %135 = vector.shape_cast %134 : vector<1x128x512xf32> to vector<128x512xf32>
    %cst_60 = arith.constant dense<0.000000e+00> : vector<8x512xf32>
    %136 = tpu.matmul %124, %135, %cst_60 {dimension_numbers = #tpu.dot_dimension_numbers<[1], [0], [0], [1], [0, 0, 1, 1], [], []>} : vector<8x128xf32>, vector<128x512xf32>, vector<8x512xf32> -> vector<8x512xf32>
    %137 = arith.addf %133, %136 : vector<8x512xf32>
    %138 = vector.extract_strided_slice %137 {offsets = [0, 0], sizes = [8, 128], strides = [1, 1]} : vector<8x512xf32> to vector<8x128xf32>
    %139 = arith.negf %138 : vector<8x128xf32>
    %140 = math.exp %139 : vector<8x128xf32>
    %cst_61 = arith.constant 1.000000e+00 : f32
    %141 = vector.broadcast %cst_61 : f32 to vector<8x128xf32>
    %142 = arith.addf %141, %140 : vector<8x128xf32>
    %143 = arith.divf %141, %142 : vector<8x128xf32>
    %144 = vector.extract_strided_slice %137 {offsets = [0, 128], sizes = [8, 128], strides = [1, 1]} : vector<8x512xf32> to vector<8x128xf32>
    %145 = arith.negf %144 : vector<8x128xf32>
    %146 = math.exp %145 : vector<8x128xf32>
    %cst_62 = arith.constant 1.000000e+00 : f32
    %147 = vector.broadcast %cst_62 : f32 to vector<8x128xf32>
    %148 = arith.addf %147, %146 : vector<8x128xf32>
    %149 = arith.divf %147, %148 : vector<8x128xf32>
    %150 = vector.extract_strided_slice %137 {offsets = [0, 256], sizes = [8, 128], strides = [1, 1]} : vector<8x512xf32> to vector<8x128xf32>
    %151 = math.tanh %150 : vector<8x128xf32>
    %152 = vector.extract_strided_slice %137 {offsets = [0, 384], sizes = [8, 128], strides = [1, 1]} : vector<8x512xf32> to vector<8x128xf32>
    %153 = arith.negf %152 : vector<8x128xf32>
    %154 = math.exp %153 : vector<8x128xf32>
    %cst_63 = arith.constant 1.000000e+00 : f32
    %155 = vector.broadcast %cst_63 : f32 to vector<8x128xf32>
    %156 = arith.addf %155, %154 : vector<8x128xf32>
    %157 = arith.divf %155, %156 : vector<8x128xf32>
    %158 = arith.mulf %149, %122 : vector<8x128xf32>
    %159 = arith.mulf %143, %151 : vector<8x128xf32>
    %160 = arith.addf %158, %159 : vector<8x128xf32>
    %161 = math.tanh %160 : vector<8x128xf32>
    %162 = arith.mulf %157, %161 : vector<8x128xf32>
    %c0_i32_64 = arith.constant 0 : i32
    %163 = arith.addi %c0_i32_64, %c3_i32 : i32
    %164 = arith.index_cast %163 : i32 to index
    %c0_65 = arith.constant 0 : index
    %c0_66 = arith.constant 0 : index
    %165 = vector.load %arg7[%164, %c0_65, %c0_66] : memref<8x8x128xf32, #tpu.memory_space<vmem>>, vector<1x8x128xf32>
    %166 = vector.shape_cast %165 : vector<1x8x128xf32> to vector<8x128xf32>
    %167 = vector.shape_cast %162 : vector<8x128xf32> to vector<1x8x128xf32>
    tpu.vector_store %arg7[%164, %c0_65, %c0_66], %167 {strides = array<i32>} : memref<8x8x128xf32, #tpu.memory_space<vmem>>, vector<1x8x128xf32>,
    %c4_i32 = arith.constant 4 : i32
    %c0_i32_67 = arith.constant 0 : i32
    %168 = arith.addi %c0_i32_67, %c4_i32 : i32
    %169 = arith.index_cast %168 : i32 to index
    %c0_68 = arith.constant 0 : index
    %c0_69 = arith.constant 0 : index
    %170 = vector.load %arg8[%169, %c0_68, %c0_69] : memref<16x8x512xf32, #tpu.memory_space<vmem>>, vector<1x8x512xf32>
    %171 = vector.shape_cast %170 : vector<1x8x512xf32> to vector<8x512xf32>
    %c0_70 = arith.constant 0 : index
    %c0_71 = arith.constant 0 : index
    %c0_72 = arith.constant 0 : index
    %172 = vector.load %arg3[%c0_70, %c0_71, %c0_72] : memref<1x128x512xf32, #tpu.memory_space<vmem>>, vector<1x128x512xf32>
    %173 = vector.shape_cast %172 : vector<1x128x512xf32> to vector<128x512xf32>
    %cst_73 = arith.constant dense<0.000000e+00> : vector<8x512xf32>
    %174 = tpu.matmul %162, %173, %cst_73 {dimension_numbers = #tpu.dot_dimension_numbers<[1], [0], [0], [1], [0, 0, 1, 1], [], []>} : vector<8x128xf32>, vector<128x512xf32>, vector<8x512xf32> -> vector<8x512xf32>
    %175 = arith.addf %171, %174 : vector<8x512xf32>
    %176 = vector.extract_strided_slice %175 {offsets = [0, 0], sizes = [8, 128], strides = [1, 1]} : vector<8x512xf32> to vector<8x128xf32>
    %177 = arith.negf %176 : vector<8x128xf32>
    %178 = math.exp %177 : vector<8x128xf32>
    %cst_74 = arith.constant 1.000000e+00 : f32
    %179 = vector.broadcast %cst_74 : f32 to vector<8x128xf32>
    %180 = arith.addf %179, %178 : vector<8x128xf32>
    %181 = arith.divf %179, %180 : vector<8x128xf32>
    %182 = vector.extract_strided_slice %175 {offsets = [0, 128], sizes = [8, 128], strides = [1, 1]} : vector<8x512xf32> to vector<8x128xf32>
    %183 = arith.negf %182 : vector<8x128xf32>
    %184 = math.exp %183 : vector<8x128xf32>
    %cst_75 = arith.constant 1.000000e+00 : f32
    %185 = vector.broadcast %cst_75 : f32 to vector<8x128xf32>
    %186 = arith.addf %185, %184 : vector<8x128xf32>
    %187 = arith.divf %185, %186 : vector<8x128xf32>
    %188 = vector.extract_strided_slice %175 {offsets = [0, 256], sizes = [8, 128], strides = [1, 1]} : vector<8x512xf32> to vector<8x128xf32>
    %189 = math.tanh %188 : vector<8x128xf32>
    %190 = vector.extract_strided_slice %175 {offsets = [0, 384], sizes = [8, 128], strides = [1, 1]} : vector<8x512xf32> to vector<8x128xf32>
    %191 = arith.negf %190 : vector<8x128xf32>
    %192 = math.exp %191 : vector<8x128xf32>
    %cst_76 = arith.constant 1.000000e+00 : f32
    %193 = vector.broadcast %cst_76 : f32 to vector<8x128xf32>
    %194 = arith.addf %193, %192 : vector<8x128xf32>
    %195 = arith.divf %193, %194 : vector<8x128xf32>
    %196 = arith.mulf %187, %160 : vector<8x128xf32>
    %197 = arith.mulf %181, %189 : vector<8x128xf32>
    %198 = arith.addf %196, %197 : vector<8x128xf32>
    %199 = math.tanh %198 : vector<8x128xf32>
    %200 = arith.mulf %195, %199 : vector<8x128xf32>
    %c0_i32_77 = arith.constant 0 : i32
    %201 = arith.addi %c0_i32_77, %c4_i32 : i32
    %202 = arith.index_cast %201 : i32 to index
    %c0_78 = arith.constant 0 : index
    %c0_79 = arith.constant 0 : index
    %203 = vector.load %arg7[%202, %c0_78, %c0_79] : memref<8x8x128xf32, #tpu.memory_space<vmem>>, vector<1x8x128xf32>
    %204 = vector.shape_cast %203 : vector<1x8x128xf32> to vector<8x128xf32>
    %205 = vector.shape_cast %200 : vector<8x128xf32> to vector<1x8x128xf32>
    tpu.vector_store %arg7[%202, %c0_78, %c0_79], %205 {strides = array<i32>} : memref<8x8x128xf32, #tpu.memory_space<vmem>>, vector<1x8x128xf32>,
    %c5_i32 = arith.constant 5 : i32
    %c0_i32_80 = arith.constant 0 : i32
    %206 = arith.addi %c0_i32_80, %c5_i32 : i32
    %207 = arith.index_cast %206 : i32 to index
    %c0_81 = arith.constant 0 : index
    %c0_82 = arith.constant 0 : index
    %208 = vector.load %arg8[%207, %c0_81, %c0_82] : memref<16x8x512xf32, #tpu.memory_space<vmem>>, vector<1x8x512xf32>
    %209 = vector.shape_cast %208 : vector<1x8x512xf32> to vector<8x512xf32>
    %c0_83 = arith.constant 0 : index
    %c0_84 = arith.constant 0 : index
    %c0_85 = arith.constant 0 : index
    %210 = vector.load %arg3[%c0_83, %c0_84, %c0_85] : memref<1x128x512xf32, #tpu.memory_space<vmem>>, vector<1x128x512xf32>
    %211 = vector.shape_cast %210 : vector<1x128x512xf32> to vector<128x512xf32>
    %cst_86 = arith.constant dense<0.000000e+00> : vector<8x512xf32>
    %212 = tpu.matmul %200, %211, %cst_86 {dimension_numbers = #tpu.dot_dimension_numbers<[1], [0], [0], [1], [0, 0, 1, 1], [], []>} : vector<8x128xf32>, vector<128x512xf32>, vector<8x512xf32> -> vector<8x512xf32>
    %213 = arith.addf %209, %212 : vector<8x512xf32>
    %214 = vector.extract_strided_slice %213 {offsets = [0, 0], sizes = [8, 128], strides = [1, 1]} : vector<8x512xf32> to vector<8x128xf32>
    %215 = arith.negf %214 : vector<8x128xf32>
    %216 = math.exp %215 : vector<8x128xf32>
    %cst_87 = arith.constant 1.000000e+00 : f32
    %217 = vector.broadcast %cst_87 : f32 to vector<8x128xf32>
    %218 = arith.addf %217, %216 : vector<8x128xf32>
    %219 = arith.divf %217, %218 : vector<8x128xf32>
    %220 = vector.extract_strided_slice %213 {offsets = [0, 128], sizes = [8, 128], strides = [1, 1]} : vector<8x512xf32> to vector<8x128xf32>
    %221 = arith.negf %220 : vector<8x128xf32>
    %222 = math.exp %221 : vector<8x128xf32>
    %cst_88 = arith.constant 1.000000e+00 : f32
    %223 = vector.broadcast %cst_88 : f32 to vector<8x128xf32>
    %224 = arith.addf %223, %222 : vector<8x128xf32>
    %225 = arith.divf %223, %224 : vector<8x128xf32>
    %226 = vector.extract_strided_slice %213 {offsets = [0, 256], sizes = [8, 128], strides = [1, 1]} : vector<8x512xf32> to vector<8x128xf32>
    %227 = math.tanh %226 : vector<8x128xf32>
    %228 = vector.extract_strided_slice %213 {offsets = [0, 384], sizes = [8, 128], strides = [1, 1]} : vector<8x512xf32> to vector<8x128xf32>
    %229 = arith.negf %228 : vector<8x128xf32>
    %230 = math.exp %229 : vector<8x128xf32>
    %cst_89 = arith.constant 1.000000e+00 : f32
    %231 = vector.broadcast %cst_89 : f32 to vector<8x128xf32>
    %232 = arith.addf %231, %230 : vector<8x128xf32>
    %233 = arith.divf %231, %232 : vector<8x128xf32>
    %234 = arith.mulf %225, %198 : vector<8x128xf32>
    %235 = arith.mulf %219, %227 : vector<8x128xf32>
    %236 = arith.addf %234, %235 : vector<8x128xf32>
    %237 = math.tanh %236 : vector<8x128xf32>
    %238 = arith.mulf %233, %237 : vector<8x128xf32>
    %c0_i32_90 = arith.constant 0 : i32
    %239 = arith.addi %c0_i32_90, %c5_i32 : i32
    %240 = arith.index_cast %239 : i32 to index
    %c0_91 = arith.constant 0 : index
    %c0_92 = arith.constant 0 : index
    %241 = vector.load %arg7[%240, %c0_91, %c0_92] : memref<8x8x128xf32, #tpu.memory_space<vmem>>, vector<1x8x128xf32>
    %242 = vector.shape_cast %241 : vector<1x8x128xf32> to vector<8x128xf32>
    %243 = vector.shape_cast %238 : vector<8x128xf32> to vector<1x8x128xf32>
    tpu.vector_store %arg7[%240, %c0_91, %c0_92], %243 {strides = array<i32>} : memref<8x8x128xf32, #tpu.memory_space<vmem>>, vector<1x8x128xf32>,
    %c6_i32 = arith.constant 6 : i32
    %c0_i32_93 = arith.constant 0 : i32
    %244 = arith.addi %c0_i32_93, %c6_i32 : i32
    %245 = arith.index_cast %244 : i32 to index
    %c0_94 = arith.constant 0 : index
    %c0_95 = arith.constant 0 : index
    %246 = vector.load %arg8[%245, %c0_94, %c0_95] : memref<16x8x512xf32, #tpu.memory_space<vmem>>, vector<1x8x512xf32>
    %247 = vector.shape_cast %246 : vector<1x8x512xf32> to vector<8x512xf32>
    %c0_96 = arith.constant 0 : index
    %c0_97 = arith.constant 0 : index
    %c0_98 = arith.constant 0 : index
    %248 = vector.load %arg3[%c0_96, %c0_97, %c0_98] : memref<1x128x512xf32, #tpu.memory_space<vmem>>, vector<1x128x512xf32>
    %249 = vector.shape_cast %248 : vector<1x128x512xf32> to vector<128x512xf32>
    %cst_99 = arith.constant dense<0.000000e+00> : vector<8x512xf32>
    %250 = tpu.matmul %238, %249, %cst_99 {dimension_numbers = #tpu.dot_dimension_numbers<[1], [0], [0], [1], [0, 0, 1, 1], [], []>} : vector<8x128xf32>, vector<128x512xf32>, vector<8x512xf32> -> vector<8x512xf32>
    %251 = arith.addf %247, %250 : vector<8x512xf32>
    %252 = vector.extract_strided_slice %251 {offsets = [0, 0], sizes = [8, 128], strides = [1, 1]} : vector<8x512xf32> to vector<8x128xf32>
    %253 = arith.negf %252 : vector<8x128xf32>
    %254 = math.exp %253 : vector<8x128xf32>
    %cst_100 = arith.constant 1.000000e+00 : f32
    %255 = vector.broadcast %cst_100 : f32 to vector<8x128xf32>
    %256 = arith.addf %255, %254 : vector<8x128xf32>
    %257 = arith.divf %255, %256 : vector<8x128xf32>
    %258 = vector.extract_strided_slice %251 {offsets = [0, 128], sizes = [8, 128], strides = [1, 1]} : vector<8x512xf32> to vector<8x128xf32>
    %259 = arith.negf %258 : vector<8x128xf32>
    %260 = math.exp %259 : vector<8x128xf32>
    %cst_101 = arith.constant 1.000000e+00 : f32
    %261 = vector.broadcast %cst_101 : f32 to vector<8x128xf32>
    %262 = arith.addf %261, %260 : vector<8x128xf32>
    %263 = arith.divf %261, %262 : vector<8x128xf32>
    %264 = vector.extract_strided_slice %251 {offsets = [0, 256], sizes = [8, 128], strides = [1, 1]} : vector<8x512xf32> to vector<8x128xf32>
    %265 = math.tanh %264 : vector<8x128xf32>
    %266 = vector.extract_strided_slice %251 {offsets = [0, 384], sizes = [8, 128], strides = [1, 1]} : vector<8x512xf32> to vector<8x128xf32>
    %267 = arith.negf %266 : vector<8x128xf32>
    %268 = math.exp %267 : vector<8x128xf32>
    %cst_102 = arith.constant 1.000000e+00 : f32
    %269 = vector.broadcast %cst_102 : f32 to vector<8x128xf32>
    %270 = arith.addf %269, %268 : vector<8x128xf32>
    %271 = arith.divf %269, %270 : vector<8x128xf32>
    %272 = arith.mulf %263, %236 : vector<8x128xf32>
    %273 = arith.mulf %257, %265 : vector<8x128xf32>
    %274 = arith.addf %272, %273 : vector<8x128xf32>
    %275 = math.tanh %274 : vector<8x128xf32>
    %276 = arith.mulf %271, %275 : vector<8x128xf32>
    %c0_i32_103 = arith.constant 0 : i32
    %277 = arith.addi %c0_i32_103, %c6_i32 : i32
    %278 = arith.index_cast %277 : i32 to index
    %c0_104 = arith.constant 0 : index
    %c0_105 = arith.constant 0 : index
    %279 = vector.load %arg7[%278, %c0_104, %c0_105] : memref<8x8x128xf32, #tpu.memory_space<vmem>>, vector<1x8x128xf32>
    %280 = vector.shape_cast %279 : vector<1x8x128xf32> to vector<8x128xf32>
    %281 = vector.shape_cast %276 : vector<8x128xf32> to vector<1x8x128xf32>
    tpu.vector_store %arg7[%278, %c0_104, %c0_105], %281 {strides = array<i32>} : memref<8x8x128xf32, #tpu.memory_space<vmem>>, vector<1x8x128xf32>,
    %c7_i32 = arith.constant 7 : i32
    %c0_i32_106 = arith.constant 0 : i32
    %282 = arith.addi %c0_i32_106, %c7_i32 : i32
    %283 = arith.index_cast %282 : i32 to index
    %c0_107 = arith.constant 0 : index
    %c0_108 = arith.constant 0 : index
    %284 = vector.load %arg8[%283, %c0_107, %c0_108] : memref<16x8x512xf32, #tpu.memory_space<vmem>>, vector<1x8x512xf32>
    %285 = vector.shape_cast %284 : vector<1x8x512xf32> to vector<8x512xf32>
    %c0_109 = arith.constant 0 : index
    %c0_110 = arith.constant 0 : index
    %c0_111 = arith.constant 0 : index
    %286 = vector.load %arg3[%c0_109, %c0_110, %c0_111] : memref<1x128x512xf32, #tpu.memory_space<vmem>>, vector<1x128x512xf32>
    %287 = vector.shape_cast %286 : vector<1x128x512xf32> to vector<128x512xf32>
    %cst_112 = arith.constant dense<0.000000e+00> : vector<8x512xf32>
    %288 = tpu.matmul %276, %287, %cst_112 {dimension_numbers = #tpu.dot_dimension_numbers<[1], [0], [0], [1], [0, 0, 1, 1], [], []>} : vector<8x128xf32>, vector<128x512xf32>, vector<8x512xf32> -> vector<8x512xf32>
    %289 = arith.addf %285, %288 : vector<8x512xf32>
    %290 = vector.extract_strided_slice %289 {offsets = [0, 0], sizes = [8, 128], strides = [1, 1]} : vector<8x512xf32> to vector<8x128xf32>
    %291 = arith.negf %290 : vector<8x128xf32>
    %292 = math.exp %291 : vector<8x128xf32>
    %cst_113 = arith.constant 1.000000e+00 : f32
    %293 = vector.broadcast %cst_113 : f32 to vector<8x128xf32>
    %294 = arith.addf %293, %292 : vector<8x128xf32>
    %295 = arith.divf %293, %294 : vector<8x128xf32>
    %296 = vector.extract_strided_slice %289 {offsets = [0, 128], sizes = [8, 128], strides = [1, 1]} : vector<8x512xf32> to vector<8x128xf32>
    %297 = arith.negf %296 : vector<8x128xf32>
    %298 = math.exp %297 : vector<8x128xf32>
    %cst_114 = arith.constant 1.000000e+00 : f32
    %299 = vector.broadcast %cst_114 : f32 to vector<8x128xf32>
    %300 = arith.addf %299, %298 : vector<8x128xf32>
    %301 = arith.divf %299, %300 : vector<8x128xf32>
    %302 = vector.extract_strided_slice %289 {offsets = [0, 256], sizes = [8, 128], strides = [1, 1]} : vector<8x512xf32> to vector<8x128xf32>
    %303 = math.tanh %302 : vector<8x128xf32>
    %304 = vector.extract_strided_slice %289 {offsets = [0, 384], sizes = [8, 128], strides = [1, 1]} : vector<8x512xf32> to vector<8x128xf32>
    %305 = arith.negf %304 : vector<8x128xf32>
    %306 = math.exp %305 : vector<8x128xf32>
    %cst_115 = arith.constant 1.000000e+00 : f32
    %307 = vector.broadcast %cst_115 : f32 to vector<8x128xf32>
    %308 = arith.addf %307, %306 : vector<8x128xf32>
    %309 = arith.divf %307, %308 : vector<8x128xf32>
    %310 = arith.mulf %301, %274 : vector<8x128xf32>
    %311 = arith.mulf %295, %303 : vector<8x128xf32>
    %312 = arith.addf %310, %311 : vector<8x128xf32>
    %313 = math.tanh %312 : vector<8x128xf32>
    %314 = arith.mulf %309, %313 : vector<8x128xf32>
    %c0_i32_116 = arith.constant 0 : i32
    %315 = arith.addi %c0_i32_116, %c7_i32 : i32
    %316 = arith.index_cast %315 : i32 to index
    %c0_117 = arith.constant 0 : index
    %c0_118 = arith.constant 0 : index
    %317 = vector.load %arg7[%316, %c0_117, %c0_118] : memref<8x8x128xf32, #tpu.memory_space<vmem>>, vector<1x8x128xf32>
    %318 = vector.shape_cast %317 : vector<1x8x128xf32> to vector<8x128xf32>
    %319 = vector.shape_cast %314 : vector<8x128xf32> to vector<1x8x128xf32>
    tpu.vector_store %arg7[%316, %c0_117, %c0_118], %319 {strides = array<i32>} : memref<8x8x128xf32, #tpu.memory_space<vmem>>, vector<1x8x128xf32>,
    %c8_i32 = arith.constant 8 : i32
    %c0_119 = arith.constant 0 : index
    %c0_120 = arith.constant 0 : index
    %c0_121 = arith.constant 0 : index
    %320 = vector.load %arg5[%c0_119, %c0_120, %c0_121] : memref<1x8x128xf32, #tpu.memory_space<vmem>>, vector<1x8x128xf32>
    %321 = vector.shape_cast %320 : vector<1x8x128xf32> to vector<8x128xf32>
    %322 = vector.shape_cast %314 : vector<8x128xf32> to vector<1x8x128xf32>
    tpu.vector_store %arg5[%c0_119, %c0_120, %c0_121], %322 {strides = array<i32>} : memref<1x8x128xf32, #tpu.memory_space<vmem>>, vector<1x8x128xf32>,
    %c0_122 = arith.constant 0 : index
    %c0_123 = arith.constant 0 : index
    %c0_124 = arith.constant 0 : index
    %323 = vector.load %arg6[%c0_122, %c0_123, %c0_124] : memref<1x8x128xf32, #tpu.memory_space<vmem>>, vector<1x8x128xf32>
    %324 = vector.shape_cast %323 : vector<1x8x128xf32> to vector<8x128xf32>
    %325 = vector.shape_cast %312 : vector<8x128xf32> to vector<1x8x128xf32>
    tpu.vector_store %arg6[%c0_122, %c0_123, %c0_124], %325 {strides = array<i32>} : memref<1x8x128xf32, #tpu.memory_space<vmem>>, vector<1x8x128xf32>,
    return
  }
  func.func @transform_1(%arg0: i32) -> (i32, i32, i32) {
    %c0_i32 = arith.constant 0 : i32
    %c0_i32_0 = arith.constant 0 : i32
    %c0_i32_1 = arith.constant 0 : i32
    return %arg0, %c0_i32, %c0_i32_0 : i32, i32, i32
  }
  func.func @transform_2(%arg0: i32) -> (i32, i32, i32) {
    %c0_i32 = arith.constant 0 : i32
    %c0_i32_0 = arith.constant 0 : i32
    %c0_i32_1 = arith.constant 0 : i32
    return %arg0, %c0_i32, %c0_i32_0 : i32, i32, i32
  }
  func.func @transform_3(%arg0: i32) -> (i32, i32, i32) {
    %c0_i32 = arith.constant 0 : i32
    %c0_i32_0 = arith.constant 0 : i32
    %c0_i32_1 = arith.constant 0 : i32
    return %arg0, %c0_i32, %c0_i32_0 : i32, i32, i32
  }
  func.func @transform_4(%arg0: i32) -> (i32, i32, i32) {
    %c0_i32 = arith.constant 0 : i32
    %c0_i32_0 = arith.constant 0 : i32
    %c0_i32_1 = arith.constant 0 : i32
    return %arg0, %c0_i32, %c0_i32_0 : i32, i32, i32
  }
  func.func @transform_5(%arg0: i32) -> (i32, i32, i32) {
    %c0_i32 = arith.constant 0 : i32
    %c0_i32_0 = arith.constant 0 : i32
    %c0_i32_1 = arith.constant 0 : i32
    return %arg0, %c0_i32, %c0_i32_0 : i32, i32, i32
  }
}

</mosaic_0001>

<bundles_post_ra>
// kernel: encoder_forward.1
= control target key start
LH: loop header
LB: loop body
LE: loop exit
PB: predicated region body
PF: predicated region fallthrough
CT: control target
= control target key end

     0   :  { %11 = vsyncpa [#allocation5], 0  ;;  %s4658_s0 = inlined_call_operand.vmem [shape: f32[8,8,128], index: 0, kind: input, shape index: {}]   ;;  %s4659_s1 = inlined_call_operand.hbm [shape: f32[2,128,512], index: 1, kind: input, shape index: {}]   ;;  %s4660_s2 = inlined_call_operand.hbm [shape: f32[2,128,512], index: 2, kind: input, shape index: {}]   ;;  %s4661_s3 = inlined_call_operand.vmem [shape: f32[2,1,512], index: 3, kind: input, shape index: {}]   ;;  %s4662_s4 = inlined_call_operand.vmem [shape: f32[2,8,128], index: 4, kind: output, shape index: {0}]   ;;  %s4663_s5 = inlined_call_operand.vmem [shape: f32[2,8,128], index: 5, kind: output, shape index: {1}]  }
   0x1   :  { %13 = vsyncpa [#allocation5 + $0x1], 0 }
   0x2   :  { %14 = vsyncpa [#allocation7], 0 }
   0x3   :  { %16 = vsyncpa [#allocation7 + $0x1], 0  ;;  %s3764_s18 = smov 0   ;;  %s3766_s19 = smov 0  }
   0x4   :  { %s3768_s20 = smov 0   ;;  %s3770_s21 = smov 0  }
   0x5 LB: > { %s3783_s22 = sadd.s32 4294967295, %s3727_s21   ;;  %s3786_s23 = sadd.s32 1, %s3727_s21   ;;  %s3727_s21 = sphi %s3770_s21, %s4673_s21   ;;  %s3723_s20 = sphi %s3768_s20, %s4672_s20   ;;  %s3719_s19 = sphi %s3766_s19, %s4671_s19   ;;  %s3715_s18 = sphi %s3764_s18, %s4670_s18  }
   0x6   : > { %s26_s24 = ssub.s32 %s3727_s21, %s3786_s23  ;;  %s29_s25 = sadd.s32 1, %s3723_s20 }
   0x7   : > { %p27_p0 = scmp.eq.s32.totalorder %s26_s24, 0  ;;  %p36_p1 = scmp.ne.s32.totalorder %s3723_s20, %s3719_s19 }
   0x8   : > { %p37_p2 = scmp.eq.s32.totalorder %s3727_s21, 0  ;;  %p42_p3 = scmp.ne.s32.totalorder %s3719_s19, %s3715_s18 }
   0x9   : > { %s3796_s26 = scalar_select %p27_p0, %s3723_s20, %s29_s25  }
   0xa   : > { %p38_p4 = por %p37_p2, %p36_p1  ;;  %p43_p5 = scmp.eq.s32.totalorder %s3783_s22, 0 }
   0xb   : > { %p3463_p6 = scmp.lt.s32.totalorder %s3727_s21, 2  ;;  %s3805_s28 = sand.u32 1, %s3723_s20  }
   0xc   : > { %p3800_p7 = por %p43_p5, %p42_p3  ;;  %s2771_s29 = sshll.u32 %s3805_s28, 9 }
   0xd   : > { %s2810_s30 = sshll.u32 %s3727_s21, 13  ;;  %s174_s9 = scalar_lea.vmem [#allocation4], %s2771_s29 }
   0xe   : > { %s4665_s27 = scalar_select %p3800_p7, 1, 0 }
   0xf   : > { %s3814_s8 = scalar_lea.hbm %s4659_s1, %s2810_s30  ;;  %s181_s10 = sshll.u32 %s174_s9, 4  ;;  %s3818_s10 = int_to_ptr.vmem [resolvable:$true] %s181_s10 }
  0x10   : > { %p3820_p8 = pnand %p3463_p6, %p38_p4  ;;  %s171_s12 = scalar_lea.sflag [#allocation5], %s3805_s28 }
  0x11   : > { %s3627_s13 = scalar_lea.hbm %s3814_s8, 8192  ;;  %s3632_s16 = scalar_lea.hbm %s4659_s1, 16384 }
  0x12   : > { %p3628_p10 = scmp.ne.s32.totalorder %s3814_s8, %s3627_s13  ;;  %p3629_p11 = pneg %p3820_p8 }
  0x13   : > { %p3633_p0 = scmp.lt.u32.totalorder %s3814_s8, %s4659_s1  ;;  %p3634_p1 = scmp.lt.u32.totalorder %s3632_s16, %s3627_s13 }
  0x14   : > { %p3630_p12 = pnand %p3629_p11, %p3628_p10  ;;  %p3636_p3 = scmp.lt.u32.totalorder %s3627_s13, %s3814_s8 }
  0x15   : > { %p3635_p2 = por %p3634_p1, %p3633_p0 }
  0x16   : > { %p3631_p13 = pneg %p3630_p12 }
  0x17   : > { %p3637_p4 = por %p3636_p3, %p3635_p2 }
  0x19   : > { %p3638_p5 = pnand %p3637_p4, %p3631_p13 }
  0x1b   : > { %3641 = shalt.err (!%p3638_p5)
}
  0x1c   : > { %s3642_s24 = scalar_lea.vmem %s3818_s10, 8192  ;;  %s3729_s25 = smov [#allocation4]  }
  0x1d   : > { %p3643_p6 = scmp.ne.s32.totalorder %s3818_s10, %s3642_s24  ;;  %s3647_s6 = sshll.u32 %s3729_s25, 4  ;;  %s3648_s6 = int_to_ptr.vmem [resolvable:$false] %s3647_s6 }
  0x1e   : > { %s3649_s7 = scalar_lea.vmem %s3648_s6, 16384  ;;  %p3650_p9 = scmp.lt.s32.totalorder %s3818_s10, %s3648_s6 }
  0x1f   : > { %p3645_p10 = pnand %p3643_p6, %p3629_p11  ;;  %p3651_p0 = scmp.lt.s32.totalorder %s3649_s7, %s3642_s24 }
  0x21   : > { %p3646_p12 = pneg %p3645_p10  ;;  %p3652_p1 = por %p3651_p0, %p3650_p9 }
  0x23   : > { %p3653_p2 = pnand %p3652_p1, %p3646_p12 }
  0x25   : > { %3656 = shalt.err (!%p3653_p2)
}
  0x26   : > { %s3730_s9 = smov 512   ;;  %s3731_s13 = smov 32  }
  0x27   : > { %3459 = dma.hbm_to_vmem [thread:$0]  (!%p3820_p8), %s3814_s8, 8192, %s3818_s10, %s171_s12, %s3730_s9, %s3730_s9, %s3731_s13  }
  0x28   : > { %p217_p9 = scmp.lt.s32.totalorder %s3727_s21, 3  ;;  %s3862_s16 = scalar_lea.hbm %s4660_s2, %s2810_s30 }
  0x29   : > { %p4667_p13 = scmp.ge.s32.totalorder %s3727_s21, 1  ;;  %s195_s18 = scalar_lea.vmem [#allocation6], %s2771_s29 }
  0x2a   : > { %s202_s24 = sshll.u32 %s195_s18, 4  ;;  %s192_s8 = scalar_lea.sflag [#allocation7], %s3805_s28  ;;  %s3872_s24 = int_to_ptr.vmem [resolvable:$true] %s202_s24 }
  0x2b   : > { %p3866_p3 = pnand %p4667_p13, %p217_p9  ;;  %s3657_s10 = scalar_lea.hbm %s3862_s16, 8192 }
  0x2c   : > { %p3658_p4 = scmp.ne.s32.totalorder %s3862_s16, %s3657_s10  ;;  %s3662_s12 = scalar_lea.hbm %s4660_s2, 16384 }
  0x2d   : > { %p3663_p10 = scmp.lt.u32.totalorder %s3862_s16, %s4660_s2  ;;  %p3664_p12 = scmp.lt.u32.totalorder %s3662_s12, %s3657_s10 }
  0x2e   : > { %p3660_p5 = pnand %p3658_p4, %p3629_p11  ;;  %p3666_p1 = scmp.lt.u32.totalorder %s3657_s10, %s3862_s16 }
  0x2f   : > { %p3665_p0 = por %p3664_p12, %p3663_p10 }
  0x30   : > { %p3661_p6 = pneg %p3660_p5 }
  0x31   : > { %p3667_p2 = por %p3666_p1, %p3665_p0 }
  0x33   : > { %p3668_p9 = pnand %p3667_p2, %p3661_p6 }
  0x35   : > { %3671 = shalt.err (!%p3668_p9)
}
  0x36   : > { %s3672_s29 = scalar_lea.vmem %s3872_s24, 8192  ;;  %s3732_s7 = smov [#allocation6]  }
  0x37   : > { %p3673_p13 = scmp.ne.s32.totalorder %s3872_s24, %s3672_s29  ;;  %s3677_s14 = sshll.u32 %s3732_s7, 4  ;;  %s3678_s14 = int_to_ptr.vmem [resolvable:$false] %s3677_s14 }
  0x38   : > { %s3679_s15 = scalar_lea.vmem %s3678_s14, 16384  ;;  %p3680_p7 = scmp.lt.s32.totalorder %s3872_s24, %s3678_s14 }
  0x39   : > { %p3675_p4 = pnand %p3673_p13, %p3629_p11  ;;  %p3681_p10 = scmp.lt.s32.totalorder %s3679_s15, %s3672_s29 }
  0x3b   : > { %p3676_p5 = pneg %p3675_p4  ;;  %p3682_p12 = por %p3681_p10, %p3680_p7 }
  0x3d   : > { %p3683_p0 = pnand %p3682_p12, %p3676_p5 }
  0x3f   : > { %3686 = shalt.err (!%p3683_p0)
}
  0x40   : > { %3462 = dma.hbm_to_vmem [thread:$0]  (!%p3820_p8), %s3862_s16, 8192, %s3872_s24, %s192_s8, %s3730_s9, %s3730_s9, %s3731_s13  }
  0x41   : > { %221 = sbr.rel (%p3866_p3) target bundleno = 2226 (0x8b2), region = 32  ;;  %s223_s18 = sand.u32 (!%p3866_p3), 1, %s3719_s19  }
  0x42   : > { %s2778_s10 = sshll.u32 (!%p3866_p3), %s223_s18, 9  ;;  %s224_s21 = scalar_lea.sflag (!%p3866_p3), [#allocation5], %s223_s18 }
  0x43   : > { %s3906_s30 = scalar_lea.vmem (!%p3866_p3), [#allocation4], %s2778_s10  ;;  %p4669_p7 = scmp.ne.s32.totalorder (!%p3866_p3), %s4665_s27, 0 }
  0x48   : > { %3704 = dma.done.wait (%p4669_p7), %s224_s21, 8192  }
  0x49   : > { %3706 = vsyncadd (%p4669_p7), %s224_s21, 4294959104  ;;  %s233_s28 = scalar_lea.sflag [#allocation7], %s223_s18  ;;  %s3912_s11 = scalar_lea.vmem [#allocation6], %s2778_s10 }
  0x4a   : > { %3708 = dma.done.wait (%p4669_p7), %s233_s28, 8192  }
  0x4b   : > { %3710 = vsyncadd (%p4669_p7), %s233_s28, 4294959104  ;;  %p273_p8 = scmp.lt.s32.totalorder %s3783_s22, 1  ;;  %p2783_p11 = scmp.ne.s32.totalorder %s3783_s22, 0 }
  0x4d   : > { %s274_s9 = scalar_select %p273_p8, %s3783_s22, 1 }
  0x4e   : > { %288 = sbr.rel (%p2783_p11) target bundleno = 93 (0x5d), region = 44 }
  0x4f   : > { %s2780_s13 = sshll.u32 %s274_s9, 2  ;;  %s2781_s16 = sshll.u32 %s274_s9, 3 }
  0x50   : > { %s3923_s8 = scalar_lea.vmem %s4661_s3, %s2780_s13  ;;  %s3928_s6 = scalar_lea.vmem %s4662_s4, %s2781_s16 }
  0x51   : > { %s3933_s27 = scalar_lea.vmem %s4663_s5, %s2781_s16 }
  0x55   : > { %v321_v0 = vld [vmem:[%s4658_s0] sm:$0xff]  ;;  %v323_v1 = vld [vmem:[%s4658_s0 + $0x8] sm:$0xff]  ;;  %v325_v2 = vld [vmem:[%s4658_s0 + $0x10] sm:$0xff] }
  0x56   : > { %322 = vst [vmem:[#allocation2] sm:$0xff] %v321_v0  ;;  %324 = vst [vmem:[#allocation2 + $0x8] sm:$0xff] %v323_v1  ;;  %v327_v3 = vld [vmem:[%s4658_s0 + $0x18] sm:$0xff]  ;;  %v329_v4 = vld [vmem:[%s4658_s0 + $0x20] sm:$0xff] }
  0x57   : > { %326 = vst [vmem:[#allocation2 + $0x10] sm:$0xff] %v325_v2  ;;  %v331_v5 = vld [vmem:[%s4658_s0 + $0x28] sm:$0xff]  ;;  %328 = vst [vmem:[#allocation2 + $0x18] sm:$0xff] %v327_v3  ;;  %v333_v6 = vld [vmem:[%s4658_s0 + $0x30] sm:$0xff] }
  0x58   : > { %330 = vst [vmem:[#allocation2 + $0x20] sm:$0xff] %v329_v4  ;;  %332 = vst [vmem:[#allocation2 + $0x28] sm:$0xff] %v331_v5  ;;  %v335_v7 = vld [vmem:[%s4658_s0 + $0x38] sm:$0xff] }
  0x59   : > { %334 = vst [vmem:[#allocation2 + $0x30] sm:$0xff] %v333_v6  ;;  %336 = vst [vmem:[#allocation2 + $0x38] sm:$0xff] %v335_v7 }
  0x5a   : > { %344 = vsyncadd [#allocation8], 1024 }
  0x5b   : > { %3711 = dma.done.wait [#allocation8], 1024 }
  0x5c   : > { %3712 = vsyncadd [#allocation8], 4294966272 }
  0x5d PF: > { %v358_v8 = vld [vmem:[%s3906_s30 + $0x8] sm:$0xff]  ;;  %v360_v10 = vld [vmem:[%s3906_s30 + $0x18] sm:$0xff]  ;;  %v357_v13 = vld [vmem:[%s3906_s30] sm:$0xff]  ;;  %v3733_v15 = vmov 0.0  }
  0x5e   : > { %v362_v9 = vld [vmem:[%s3906_s30 + $0x28] sm:$0xff]  ;;  %v364_v12 = vld [vmem:[%s3906_s30 + $0x38] sm:$0xff]  ;;  %v361_v14 = vld [vmem:[%s3906_s30 + $0x20] sm:$0xff]  ;;  %507 = vmatprep.mubr.f32.mxu0 %v3733_v15  ;;  %620 = vmatprep.mubr.f32.mxu1 %v3733_v15 }
  0x5f   : > { %v2812_v11 = vpack.c.bf16 %v362_v9, %v358_v8  ;;  %v2844_v16 = vpack.c.bf16 %v364_v12, %v360_v10  ;;  %v2814_v17 = vpack.c.bf16 %v361_v14, %v357_v13  ;;  %v359_v18 = vld [vmem:[%s3906_s30 + $0x10] sm:$0xff]  ;;  %v366_v20 = vld [vmem:[%s3906_s30 + $0x48] sm:$0xff]  ;;  %v368_v23 = vld [vmem:[%s3906_s30 + $0x58] sm:$0xff] }
  0x60   : > { %v363_v19 = vld [vmem:[%s3906_s30 + $0x30] sm:$0xff]  ;;  %v370_v22 = vld [vmem:[%s3906_s30 + $0x68] sm:$0xff]  ;;  %v372_v24 = vld [vmem:[%s3906_s30 + $0x78] sm:$0xff] }
  0x61   : > { %2813 = vmatprep.subr.bf16.mxu0 %v2812_v11  ;;  %v2846_v21 = vpack.c.bf16 %v363_v19, %v359_v18  ;;  %2845 = vmatprep.subr.bf16.mxu1 %v2844_v16  ;;  %v2816_v25 = vpack.c.bf16 %v370_v22, %v366_v20  ;;  %v2848_v26 = vpack.c.bf16 %v372_v24, %v368_v23  ;;  %v365_v27 = vld [vmem:[%s3906_s30 + $0x40] sm:$0xff]  ;;  %v367_v29 = vld [vmem:[%s3906_s30 + $0x50] sm:$0xff]  ;;  %v374_v32 = vld [vmem:[%s3906_s30 + $0x88] sm:$0xff] }
  0x62   : > { %2815 = vmatpush1.bf16.msra.mxu0 %v2814_v17  ;;  %v369_v28 = vld [vmem:[%s3906_s30 + $0x60] sm:$0xff]  ;;  %v371_v31 = vld [vmem:[%s3906_s30 + $0x70] sm:$0xff]  ;;  %v378_v33 = vld [vmem:[%s3906_s30 + $0xa8] sm:$0xff] }
  0x63   : > { %2847 = vmatpush1.bf16.msra.mxu1 %v2846_v21  ;;  %v2818_v30 = vpack.c.bf16 %v369_v28, %v365_v27  ;;  %2817 = vmatprep.subr.bf16.mxu0 %v2816_v25  ;;  %v2850_v34 = vpack.c.bf16 %v371_v31, %v367_v29  ;;  %v2820_v35 = vpack.c.bf16 %v378_v33, %v374_v32  ;;  %v376_v36 = vld [vmem:[%s3906_s30 + $0x98] sm:$0xff]  ;;  %v373_v38 = vld [vmem:[%s3906_s30 + $0x80] sm:$0xff]  ;;  %v375_v41 = vld [vmem:[%s3906_s30 + $0x90] sm:$0xff] }
  0x64   : > { %2849 = vmatprep.subr.bf16.mxu1 %v2848_v26  ;;  %v380_v37 = vld [vmem:[%s3906_s30 + $0xb8] sm:$0xff]  ;;  %v377_v40 = vld [vmem:[%s3906_s30 + $0xa0] sm:$0xff]  ;;  %v379_v42 = vld [vmem:[%s3906_s30 + $0xb0] sm:$0xff] }
  0x65   : > { %v2852_v39 = vpack.c.bf16 %v380_v37, %v376_v36  ;;  %v2822_v43 = vpack.c.bf16 %v377_v40, %v373_v38  ;;  %v382_v44 = vld [vmem:[%s3906_s30 + $0xc8] sm:$0xff]  ;;  %v384_v46 = vld [vmem:[%s3906_s30 + $0xd8] sm:$0xff]  ;;  %v2854_v47 = vpack.c.bf16 %v379_v42, %v375_v41  ;;  %v381_v50 = vld [vmem:[%s3906_s30 + $0xc0] sm:$0xff] }
  0x66   : > { %2819 = vmatpush1.bf16.msra.mxu0 %v2818_v30  ;;  %v386_v45 = vld [vmem:[%s3906_s30 + $0xe8] sm:$0xff]  ;;  %v388_v49 = vld [vmem:[%s3906_s30 + $0xf8] sm:$0xff]  ;;  %v385_v51 = vld [vmem:[%s3906_s30 + $0xe0] sm:$0xff] }
  0x67   : > { %2851 = vmatpush1.bf16.msra.mxu1 %v2850_v34  ;;  %2821 = vmatprep.subr.bf16.mxu0 %v2820_v35  ;;  %v2824_v48 = vpack.c.bf16 %v386_v45, %v382_v44  ;;  %v2856_v52 = vpack.c.bf16 %v388_v49, %v384_v46  ;;  %v383_v53 = vld [vmem:[%s3906_s30 + $0xd0] sm:$0xff]  ;;  %v390_v55 = vld [vmem:[%s3906_s30 + $0x108] sm:$0xff]  ;;  %v392_v57 = vld [vmem:[%s3906_s30 + $0x118] sm:$0xff]  ;;  %v2826_v59 = vpack.c.bf16 %v385_v51, %v381_v50 }
  0x68   : > { %2853 = vmatprep.subr.bf16.mxu1 %v2852_v39  ;;  %v387_v54 = vld [vmem:[%s3906_s30 + $0xf0] sm:$0xff]  ;;  %v394_v56 = vld [vmem:[%s3906_s30 + $0x128] sm:$0xff]  ;;  %v396_v58 = vld [vmem:[%s3906_s30 + $0x138] sm:$0xff] }
  0x69   : > { %v2858_v60 = vpack.c.bf16 %v387_v54, %v383_v53  ;;  %v2828_v61 = vpack.c.bf16 %v394_v56, %v390_v55  ;;  %v389_v62 = vld [vmem:[%s3906_s30 + $0x100] sm:$0xff]  ;;  %v391_v0 = vld [vmem:[%s3906_s30 + $0x110] sm:$0xff]  ;;  %v2860_v1 = vpack.c.bf16 %v396_v58, %v392_v57  ;;  %v398_v3 = vld [vmem:[%s3906_s30 + $0x148] sm:$0xff] }
  0x6a   : > { %2823 = vmatpush1.bf16.msra.mxu0 %v2822_v43  ;;  %v393_v63 = vld [vmem:[%s3906_s30 + $0x120] sm:$0xff]  ;;  %v395_v2 = vld [vmem:[%s3906_s30 + $0x130] sm:$0xff]  ;;  %v402_v4 = vld [vmem:[%s3906_s30 + $0x168] sm:$0xff] }
  0x6b   : > { %2855 = vmatpush1.bf16.msra.mxu1 %v2854_v47  ;;  %2825 = vmatprep.subr.bf16.mxu0 %v2824_v48  ;;  %v400_v5 = vld [vmem:[%s3906_s30 + $0x158] sm:$0xff]  ;;  %v2830_v7 = vpack.c.bf16 %v393_v63, %v389_v62  ;;  %v2862_v8 = vpack.c.bf16 %v395_v2, %v391_v0  ;;  %v2832_v9 = vpack.c.bf16 %v402_v4, %v398_v3  ;;  %v397_v10 = vld [vmem:[%s3906_s30 + $0x140] sm:$0xff]  ;;  %v399_v12 = vld [vmem:[%s3906_s30 + $0x150] sm:$0xff] }
  0x6c   : > { %2857 = vmatprep.subr.bf16.mxu1 %v2856_v52  ;;  %v404_v6 = vld [vmem:[%s3906_s30 + $0x178] sm:$0xff]  ;;  %v401_v11 = vld [vmem:[%s3906_s30 + $0x160] sm:$0xff]  ;;  %v403_v14 = vld [vmem:[%s3906_s30 + $0x170] sm:$0xff] }
  0x6d   : > { %v2864_v13 = vpack.c.bf16 %v404_v6, %v400_v5  ;;  %v406_v16 = vld [vmem:[%s3906_s30 + $0x188] sm:$0xff]  ;;  %v408_v18 = vld [vmem:[%s3906_s30 + $0x198] sm:$0xff]  ;;  %v2834_v20 = vpack.c.bf16 %v401_v11, %v397_v10  ;;  %v2866_v21 = vpack.c.bf16 %v403_v14, %v399_v12  ;;  %v405_v23 = vld [vmem:[%s3906_s30 + $0x180] sm:$0xff] }
  0x6e   : > { %2827 = vmatpush1.bf16.msra.mxu0 %v2826_v59  ;;  %v410_v17 = vld [vmem:[%s3906_s30 + $0x1a8] sm:$0xff]  ;;  %v412_v19 = vld [vmem:[%s3906_s30 + $0x1b8] sm:$0xff]  ;;  %v409_v24 = vld [vmem:[%s3906_s30 + $0x1a0] sm:$0xff] }
  0x6f   : > { %2859 = vmatpush1.bf16.msra.mxu1 %v2858_v60  ;;  %2829 = vmatprep.subr.bf16.mxu0 %v2828_v61  ;;  %v2836_v22 = vpack.c.bf16 %v410_v17, %v406_v16  ;;  %v407_v25 = vld [vmem:[%s3906_s30 + $0x190] sm:$0xff]  ;;  %v2868_v26 = vpack.c.bf16 %v412_v19, %v408_v18  ;;  %v414_v28 = vld [vmem:[%s3906_s30 + $0x1c8] sm:$0xff]  ;;  %v416_v30 = vld [vmem:[%s3906_s30 + $0x1d8] sm:$0xff]  ;;  %v2838_v32 = vpack.c.bf16 %v409_v24, %v405_v23 }
  0x70   : > { %2861 = vmatprep.subr.bf16.mxu1 %v2860_v1  ;;  %v411_v27 = vld [vmem:[%s3906_s30 + $0x1b0] sm:$0xff]  ;;  %v418_v29 = vld [vmem:[%s3906_s30 + $0x1e8] sm:$0xff]  ;;  %v420_v31 = vld [vmem:[%s3906_s30 + $0x1f8] sm:$0xff] }
  0x71   : > { %v2870_v33 = vpack.c.bf16 %v411_v27, %v407_v25  ;;  %v2840_v34 = vpack.c.bf16 %v418_v29, %v414_v28  ;;  %v413_v35 = vld [vmem:[%s3906_s30 + $0x1c0] sm:$0xff]  ;;  %v415_v37 = vld [vmem:[%s3906_s30 + $0x1d0] sm:$0xff]  ;;  %v2872_v38 = vpack.c.bf16 %v420_v31, %v416_v30  ;;  %v706_v40 = vld [vmem:[%s3912_s11 + $0x8] sm:$0xff] }
  0x72   : > { %2831 = vmatpush1.bf16.msra.mxu0 %v2830_v7  ;;  %v417_v36 = vld [vmem:[%s3906_s30 + $0x1e0] sm:$0xff]  ;;  %v419_v39 = vld [vmem:[%s3906_s30 + $0x1f0] sm:$0xff]  ;;  %v710_v41 = vld [vmem:[%s3912_s11 + $0x28] sm:$0xff] }
  0x73   : > { %2863 = vmatpush1.bf16.msra.mxu1 %v2862_v8  ;;  %2833 = vmatprep.subr.bf16.mxu0 %v2832_v9  ;;  %v708_v42 = vld [vmem:[%s3912_s11 + $0x18] sm:$0xff]  ;;  %v2842_v44 = vpack.c.bf16 %v417_v36, %v413_v35  ;;  %v2874_v45 = vpack.c.bf16 %v419_v39, %v415_v37  ;;  %v4030_v46 = vpack.c.bf16 %v710_v41, %v706_v40  ;;  %v705_v47 = vld [vmem:[%s3912_s11] sm:$0xff]  ;;  %v707_v50 = vld [vmem:[%s3912_s11 + $0x10] sm:$0xff] }
  0x74   : > { %2865 = vmatprep.subr.bf16.mxu1 %v2864_v13  ;;  %v712_v43 = vld [vmem:[%s3912_s11 + $0x38] sm:$0xff]  ;;  %v709_v48 = vld [vmem:[%s3912_s11 + $0x20] sm:$0xff]  ;;  %v711_v51 = vld [vmem:[%s3912_s11 + $0x30] sm:$0xff] }
  0x75   : > { %v4034_v49 = vpack.c.bf16 %v712_v43, %v708_v42  ;;  %v714_v52 = vld [vmem:[%s3912_s11 + $0x48] sm:$0xff]  ;;  %v349_v54 = vld [vmem:[#allocation2] sm:$0xff]  ;;  %v4040_v55 = vpack.c.bf16 %v709_v48, %v705_v47  ;;  %v716_v56 = vld [vmem:[%s3912_s11 + $0x58] sm:$0xff]  ;;  %v4045_v58 = vpack.c.bf16 %v711_v51, %v707_v50 }
  0x76   : > { %2835 = vmatpush1.bf16.msra.mxu0 %v2834_v20  ;;  %v718_v53 = vld [vmem:[%s3912_s11 + $0x68] sm:$0xff]  ;;  %v720_v57 = vld [vmem:[%s3912_s11 + $0x78] sm:$0xff]  ;;  %v713_v59 = vld [vmem:[%s3912_s11 + $0x40] sm:$0xff] }
  0x77   : > { %2867 = vmatpush1.bf16.msra.mxu1 %v2866_v21  ;;  %2837 = vmatprep.subr.bf16.mxu0 %v2836_v22  ;;  %v717_v60 = vld [vmem:[%s3912_s11 + $0x60] sm:$0xff]  ;;  %v4050_v61 = vpack.c.bf16 %v718_v53, %v714_v52  ;;  %v715_v62 = vld [vmem:[%s3912_s11 + $0x50] sm:$0xff]  ;;  %v4054_v0 = vpack.c.bf16 %v720_v57, %v716_v56  ;;  %v722_v1 = vld [vmem:[%s3912_s11 + $0x88] sm:$0xff] }
  0x78   : > { %2869 = vmatprep.subr.bf16.mxu1 %v2868_v26  ;;  %v719_v63 = vld [vmem:[%s3912_s11 + $0x70] sm:$0xff]  ;;  %v726_v2 = vld [vmem:[%s3912_s11 + $0xa8] sm:$0xff]  ;;  %v4059_v4 = vpack.c.bf16 %v717_v60, %v713_v59  ;;  %v724_v5 = vld [vmem:[%s3912_s11 + $0x98] sm:$0xff] }
  0x79   : > { %v350_v3 = vld [vmem:[#allocation2 + $0x8] sm:$0xff]  ;;  %v728_v6 = vld [vmem:[%s3912_s11 + $0xb8] sm:$0xff]  ;;  %v4065_v7 = vpack.c.bf16 %v719_v63, %v715_v62  ;;  %v721_v8 = vld [vmem:[%s3912_s11 + $0x80] sm:$0xff]  ;;  %v4071_v10 = vpack.c.bf16 %v726_v2, %v722_v1 }
  0x7a   : > { %2839 = vmatpush1.bf16.msra.mxu0 %v2838_v32  ;;  %v725_v9 = vld [vmem:[%s3912_s11 + $0xa0] sm:$0xff]  ;;  %v723_v11 = vld [vmem:[%s3912_s11 + $0x90] sm:$0xff]  ;;  %v4076_v13 = vpack.c.bf16 %v728_v6, %v724_v5  ;;  %v730_v14 = vld [vmem:[%s3912_s11 + $0xc8] sm:$0xff] }
  0x7b   : > { %2871 = vmatpush1.bf16.msra.mxu1 %v2870_v33  ;;  %2841 = vmatprep.subr.bf16.mxu0 %v2840_v34  ;;  %v727_v12 = vld [vmem:[%s3912_s11 + $0xb0] sm:$0xff]  ;;  %v734_v16 = vld [vmem:[%s3912_s11 + $0xe8] sm:$0xff]  ;;  %v4081_v18 = vpack.c.bf16 %v725_v9, %v721_v8  ;;  %v732_v19 = vld [vmem:[%s3912_s11 + $0xd8] sm:$0xff] }
  0x7c   : > { %2873 = vmatprep.subr.bf16.mxu1 %v2872_v38  ;;  %v351_v17 = vld [vmem:[#allocation2 + $0x10] sm:$0xff]  ;;  %v736_v20 = vld [vmem:[%s3912_s11 + $0xf8] sm:$0xff]  ;;  %v4087_v21 = vpack.c.bf16 %v727_v12, %v723_v11  ;;  %v729_v22 = vld [vmem:[%s3912_s11 + $0xc0] sm:$0xff]  ;;  %v4093_v24 = vpack.c.bf16 %v734_v16, %v730_v14 }
  0x7d   : > { %v733_v23 = vld [vmem:[%s3912_s11 + $0xe0] sm:$0xff]  ;;  %v731_v25 = vld [vmem:[%s3912_s11 + $0xd0] sm:$0xff]  ;;  %v4098_v27 = vpack.c.bf16 %v736_v20, %v732_v19  ;;  %v738_v28 = vld [vmem:[%s3912_s11 + $0x108] sm:$0xff] }
  0x7e   : > { %2843 = vmatpush1.bf16.msra.mxu0 %v2842_v44  ;;  %v735_v26 = vld [vmem:[%s3912_s11 + $0xf0] sm:$0xff]  ;;  %v742_v29 = vld [vmem:[%s3912_s11 + $0x128] sm:$0xff]  ;;  %v352_v30 = vld [vmem:[#allocation2 + $0x18] sm:$0xff]  ;;  %v4103_v31 = vpack.c.bf16 %v733_v23, %v729_v22 }
  0x7f   : > { %2875 = vmatpush1.bf16.msra.mxu1 %v2874_v45  ;;  %2877 = vmatprep.subr.bf16.mxu0 %v4030_v46  ;;  %v740_v32 = vld [vmem:[%s3912_s11 + $0x118] sm:$0xff]  ;;  %v4109_v34 = vpack.c.bf16 %v735_v26, %v731_v25  ;;  %v737_v35 = vld [vmem:[%s3912_s11 + $0x100] sm:$0xff]  ;;  %v4115_v37 = vpack.c.bf16 %v742_v29, %v738_v28  ;;  %v739_v38 = vld [vmem:[%s3912_s11 + $0x110] sm:$0xff] }
  0x80   : > { %2909 = vmatprep.subr.bf16.mxu1 %v4034_v49  ;;  %v744_v33 = vld [vmem:[%s3912_s11 + $0x138] sm:$0xff]  ;;  %v741_v36 = vld [vmem:[%s3912_s11 + $0x120] sm:$0xff]  ;;  %v743_v39 = vld [vmem:[%s3912_s11 + $0x130] sm:$0xff] }
  0x81   : > { %508 = vmatmul.mubr.f32.vlgmr.msra.gmra.mrb[0].mxu0 %v349_v54  ;;  %v4120_v40 = vpack.c.bf16 %v744_v33, %v740_v32  ;;  %v746_v41 = vld [vmem:[%s3912_s11 + $0x148] sm:$0xff]  ;;  %v353_v43 = vld [vmem:[#allocation2 + $0x20] sm:$0xff]  ;;  %v4125_v44 = vpack.c.bf16 %v741_v36, %v737_v35  ;;  %v748_v45 = vld [vmem:[%s3912_s11 + $0x158] sm:$0xff]  ;;  %v4131_v48 = vpack.c.bf16 %v743_v39, %v739_v38  ;;  %v423_v36 = vlaneseq }
  0x82   : > { %621 = vmatmul.mubr.f32.vlgmr.msra.gmra.mrb[0].mxu1 %v349_v54  ;;  %2879 = vmatpush1.bf16.msra.mxu0 %v4040_v55  ;;  %v750_v42 = vld [vmem:[%s3912_s11 + $0x168] sm:$0xff]  ;;  %v752_v47 = vld [vmem:[%s3912_s11 + $0x178] sm:$0xff]  ;;  %v745_v50 = vld [vmem:[%s3912_s11 + $0x140] sm:$0xff] }
  0x83   : > { %2911 = vmatpush1.bf16.msra.mxu1 %v4045_v58  ;;  %513 = vmatprep.mubr.f32.mxu0 %v3733_v15  ;;  %v749_v51 = vld [vmem:[%s3912_s11 + $0x160] sm:$0xff]  ;;  %v4137_v52 = vpack.c.bf16 %v750_v42, %v746_v41  ;;  %v747_v53 = vld [vmem:[%s3912_s11 + $0x150] sm:$0xff]  ;;  %v4142_v56 = vpack.c.bf16 %v752_v47, %v748_v45  ;;  %v754_v57 = vld [vmem:[%s3912_s11 + $0x188] sm:$0xff]  ;;  %v424_v38 = vshrl.u32 %v423_v36, 7 }
  0x84   : > { %626 = vmatprep.mubr.f32.mxu1 %v3733_v15  ;;  %2881 = vmatprep.subr.bf16.mxu0 %v4050_v61  ;;  %v751_v54 = vld [vmem:[%s3912_s11 + $0x170] sm:$0xff]  ;;  %v758_v59 = vld [vmem:[%s3912_s11 + $0x1a8] sm:$0xff]  ;;  %v4147_v62 = vpack.c.bf16 %v749_v51, %v745_v50  ;;  %v756_v63 = vld [vmem:[%s3912_s11 + $0x198] sm:$0xff] }
  0x85   : > { %514 = vmatmul.mubr.f32.gmra.mrb[2].mxu0 %v350_v3  ;;  %2913 = vmatprep.subr.bf16.mxu1 %v4054_v0  ;;  %v354_v60 = vld [vmem:[#allocation2 + $0x28] sm:$0xff]  ;;  %v760_v1 = vld [vmem:[%s3912_s11 + $0x1b8] sm:$0xff]  ;;  %v4153_v2 = vpack.c.bf16 %v751_v54, %v747_v53  ;;  %v757_v5 = vld [vmem:[%s3912_s11 + $0x1a0] sm:$0xff]  ;;  %v4159_v6 = vpack.c.bf16 %v758_v59, %v754_v57  ;;  %v425_v39 = vsub.s32 0, %v424_v38  ;;  %v429_v42 = vsub.s32 1, %v424_v38 }
  0x86   : > { %627 = vmatmul.mubr.f32.gmra.mrb[2].mxu1 %v350_v3  ;;  %2883 = vmatpush1.bf16.msra.mxu0 %v4059_v4  ;;  %v753_v3 = vld [vmem:[%s3912_s11 + $0x180] sm:$0xff]  ;;  %v755_v8 = vld [vmem:[%s3912_s11 + $0x190] sm:$0xff]  ;;  %v4164_v11 = vpack.c.bf16 %v760_v1, %v756_v63  ;;  %v762_v12 = vld [vmem:[%s3912_s11 + $0x1c8] sm:$0xff]  ;;  %v437_v50 = vsub.s32 3, %v424_v38  ;;  %v433_v63 = vsub.s32 2, %v424_v38 }
  0x87   : > { %2915 = vmatpush1.bf16.msra.mxu1 %v4065_v7  ;;  %519 = vmatprep.mubr.f32.mxu0 %v3733_v15  ;;  %v759_v9 = vld [vmem:[%s3912_s11 + $0x1b0] sm:$0xff]  ;;  %v766_v14 = vld [vmem:[%s3912_s11 + $0x1e8] sm:$0xff]  ;;  %v764_v19 = vld [vmem:[%s3912_s11 + $0x1d8] sm:$0xff] }
  0x88   : > { %632 = vmatprep.mubr.f32.mxu1 %v3733_v15  ;;  %2885 = vmatprep.subr.bf16.mxu0 %v4071_v10  ;;  %v355_v16 = vld [vmem:[#allocation2 + $0x30] sm:$0xff]  ;;  %v768_v20 = vld [vmem:[%s3912_s11 + $0x1f8] sm:$0xff]  ;;  %v4175_v22 = vpack.c.bf16 %v759_v9, %v755_v8  ;;  %v761_v23 = vld [vmem:[%s3912_s11 + $0x1c0] sm:$0xff]  ;;  %v4181_v26 = vpack.c.bf16 %v766_v14, %v762_v12 }
  0x89   : > { %520 = vmatmul.mubr.f32.gmra.mrb[4].mxu0 %v351_v17  ;;  %2917 = vmatprep.subr.bf16.mxu1 %v4076_v13  ;;  %v765_v25 = vld [vmem:[%s3912_s11 + $0x1e0] sm:$0xff]  ;;  %v763_v28 = vld [vmem:[%s3912_s11 + $0x1d0] sm:$0xff]  ;;  %v356_v32 = vld [vmem:[#allocation2 + $0x38] sm:$0xff] }
  0x8a   : > { %633 = vmatmul.mubr.f32.gmra.mrb[4].mxu1 %v351_v17  ;;  %2887 = vmatpush1.bf16.msra.mxu0 %v4081_v18  ;;  %v4169_v17 = vpack.c.bf16 %v757_v5, %v753_v3  ;;  %v767_v29 = vld [vmem:[%s3912_s11 + $0x1f0] sm:$0xff]  ;;  %v4189_v33 = vpack.c.bf16 %v765_v25, %v761_v23  ;;  %v421_v41 = vld [vmem:[%s3923_s8] sm:$0xf] }
  0x8b   : > { %2919 = vmatpush1.bf16.msra.mxu1 %v4087_v21  ;;  %525 = vmatprep.mubr.f32.mxu0 %v3733_v15  ;;  %v4193_v35 = vpack.c.bf16 %v767_v29, %v763_v28  ;;  %v4243_v45 = vrot.slane %v421_v41, %v429_v42  ;;  %v4250_v3 = vrot.slane %v421_v41, %v433_v63 }
  0x8c   : > { %638 = vmatprep.mubr.f32.mxu1 %v3733_v15  ;;  %2889 = vmatprep.subr.bf16.mxu0 %v4093_v24 }
  0x8d   : > { %526 = vmatmul.mubr.f32.gmra.mrb[6].mxu0 %v352_v30  ;;  %2921 = vmatprep.subr.bf16.mxu1 %v4098_v27 }
  0x8e   : > { %639 = vmatmul.mubr.f32.gmra.mrb[6].mxu1 %v352_v30  ;;  %2891 = vmatpush1.bf16.msra.mxu0 %v4103_v31  ;;  %v4186_v30 = vpack.c.bf16 %v768_v20, %v764_v19 }
  0x8f   : > { %2923 = vmatpush1.bf16.msra.mxu1 %v4109_v34  ;;  %531 = vmatprep.mubr.f32.mxu0 %v3733_v15 }
  0x90   : > { %644 = vmatprep.mubr.f32.mxu1 %v3733_v15  ;;  %2893 = vmatprep.subr.bf16.mxu0 %v4115_v37 }
  0x91   : > { %532 = vmatmul.mubr.f32.gmra.mrb[8].mxu0 %v353_v43  ;;  %2925 = vmatprep.subr.bf16.mxu1 %v4120_v40 }
  0x92   : > { %645 = vmatmul.mubr.f32.gmra.mrb[8].mxu1 %v353_v43  ;;  %2895 = vmatpush1.bf16.msra.mxu0 %v4125_v44  ;;  %v4241_v43 = vrot.slane %v421_v41, %v425_v39 }
  0x93   : > { %2927 = vmatpush1.bf16.msra.mxu1 %v4131_v48  ;;  %537 = vmatprep.mubr.f32.mxu0 %v3733_v15 }
  0x94   : > { %650 = vmatprep.mubr.f32.mxu1 %v3733_v15  ;;  %2897 = vmatprep.subr.bf16.mxu0 %v4137_v52 }
  0x95   : > { %538 = vmatmul.mubr.f32.gmra.mrb[10].mxu0 %v354_v60  ;;  %2929 = vmatprep.subr.bf16.mxu1 %v4142_v56 }
  0x96   : > { %651 = vmatmul.mubr.f32.gmra.mrb[10].mxu1 %v354_v60  ;;  %2899 = vmatpush1.bf16.msra.mxu0 %v4147_v62  ;;  %v4247_v60 = vrot.slane %v421_v41, %v437_v50 }
  0x97   : > { %2931 = vmatpush1.bf16.msra.mxu1 %v4153_v2  ;;  %543 = vmatprep.mubr.f32.mxu0 %v3733_v15 }
  0x98   : > { %656 = vmatprep.mubr.f32.mxu1 %v3733_v15  ;;  %2901 = vmatprep.subr.bf16.mxu0 %v4159_v6 }
  0x99   : > { %544 = vmatmul.mubr.f32.gmra.mrb[12].mxu0 %v355_v16  ;;  %2933 = vmatprep.subr.bf16.mxu1 %v4164_v11 }
  0x9a   : > { %657 = vmatmul.mubr.f32.gmra.mrb[12].mxu1 %v355_v16  ;;  %2903 = vmatpush1.bf16.msra.mxu0 %v4169_v17 }
  0x9b   : > { %2935 = vmatpush1.bf16.msra.mxu1 %v4175_v22  ;;  %549 = vmatprep.mubr.f32.mxu0 %v3733_v15 }
  0x9c   : > { %662 = vmatprep.mubr.f32.mxu1 %v3733_v15  ;;  %2905 = vmatprep.subr.bf16.mxu0 %v4181_v26 }
  0x9d   : > { %550 = vmatmul.mubr.f32.gmra.mrb[14].mxu0 %v356_v32  ;;  %2937 = vmatprep.subr.bf16.mxu1 %v4186_v30 }
  0x9e   : > { %663 = vmatmul.mubr.f32.gmra.mrb[14].mxu1 %v356_v32  ;;  %2907 = vmatpush1.bf16.msra.mxu0 %v4189_v33 }
  0x9f   : > { %2939 = vmatpush1.bf16.msra.mxu1 %v4193_v35  ;;  %833 = vmatprep.mubr.f32.mxu0 %v3733_v15 }
  0xa0   : > { %904 = vmatprep.mubr.f32.mxu1 %v3733_v15  ;;  %2941 = vmatprep.subr.bf16.mxu0 %v4030_v46 }
  0xa1   : > { %834 = vmatmul.mubr.f32.vlgmr.msra.gmra.mrb[0].mxu0 %v3733_v15  ;;  %2973 = vmatprep.subr.bf16.mxu1 %v4034_v49 }
  0xa2   : > { %905 = vmatmul.mubr.f32.vlgmr.msra.gmra.mrb[0].mxu1 %v3733_v15  ;;  %2943 = vmatpush1.bf16.msra.mxu0 %v4040_v55 }
  0xa3   : > { %2975 = vmatpush1.bf16.msra.mxu1 %v4045_v58  ;;  %2945 = vmatprep.subr.bf16.mxu0 %v4050_v61 }
  0xa4   : > { %2977 = vmatprep.subr.bf16.mxu1 %v4054_v0  ;;  %1073 = vmatprep.mubr.f32.mxu0 %v3733_v15 }
  0xa5   : > { %1144 = vmatprep.mubr.f32.mxu1 %v3733_v15 }
  0xa6   : > { %2947 = vmatpush1.bf16.msra.mxu0 %v4059_v4 }
  0xa7   : > { %2979 = vmatpush1.bf16.msra.mxu1 %v4065_v7  ;;  %2949 = vmatprep.subr.bf16.mxu0 %v4071_v10 }
  0xa8   : > { %2981 = vmatprep.subr.bf16.mxu1 %v4076_v13 }
  0xaa   : > { %2951 = vmatpush1.bf16.msra.mxu0 %v4081_v18 }
  0xab   : > { %2983 = vmatpush1.bf16.msra.mxu1 %v4087_v21  ;;  %2953 = vmatprep.subr.bf16.mxu0 %v4093_v24 }
  0xac   : > { %2985 = vmatprep.subr.bf16.mxu1 %v4098_v27 }
  0xae   : > { %2955 = vmatpush1.bf16.msra.mxu0 %v4103_v31 }
  0xaf   : > { %2987 = vmatpush1.bf16.msra.mxu1 %v4109_v34  ;;  %2957 = vmatprep.subr.bf16.mxu0 %v4115_v37 }
  0xb0   : > { %2989 = vmatprep.subr.bf16.mxu1 %v4120_v40 }
  0xb2   : > { %2959 = vmatpush1.bf16.msra.mxu0 %v4125_v44 }
  0xb3   : > { %2991 = vmatpush1.bf16.msra.mxu1 %v4131_v48  ;;  %2961 = vmatprep.subr.bf16.mxu0 %v4137_v52 }
  0xb4   : > { %2993 = vmatprep.subr.bf16.mxu1 %v4142_v56 }
  0xb6   : > { %2963 = vmatpush1.bf16.msra.mxu0 %v4147_v62 }
  0xb7   : > { %2995 = vmatpush1.bf16.msra.mxu1 %v4153_v2  ;;  %2965 = vmatprep.subr.bf16.mxu0 %v4159_v6 }
  0xb8   : > { %2997 = vmatprep.subr.bf16.mxu1 %v4164_v11 }
  0xba   : > { %2967 = vmatpush1.bf16.msra.mxu0 %v4169_v17 }
  0xbb   : > { %2999 = vmatpush1.bf16.msra.mxu1 %v4175_v22  ;;  %2969 = vmatprep.subr.bf16.mxu0 %v4181_v26 }
  0xbc   : > { %3001 = vmatprep.subr.bf16.mxu1 %v4186_v30 }
  0xbe   : > { %2971 = vmatpush1.bf16.msra.mxu0 %v4189_v33 }
  0xbf   : > { %3003 = vmatpush1.bf16.msra.mxu1 %v4193_v35  ;;  %3005 = vmatprep.subr.bf16.mxu0 %v4030_v46 }
  0xc0   : > { %3037 = vmatprep.subr.bf16.mxu1 %v4034_v49 }
 0x174   : > { %v835_v47 = vpop.f32.mrb[0].mxu0 }
 0x175   : > { %v3388_v51 = vadd.f32 %v835_v47, %v4241_v43  ;;  %v906_v53 = vpop.f32.mrb[0].mxu1  ;;  %v837_v54 = vpop.f32.mrb[1].mxu0 }
 0x176   : > { %v3389_v57 = vadd.f32 %v837_v54, %v4243_v45  ;;  %v908_v46 = vpop.f32.mrb[1].mxu1  ;;  %v3404_v8 = vadd.f32 %v906_v53, %v4250_v3 }
 0x177   : > { %v2784_v59 = vmul.f32 -1.442695, %v3388_v51  ;;  %v3405_v1 = vadd.f32 %v908_v46, %v4247_v60 }
 0x178   : > { %v2785_v49 = vmul.f32 -1.442695, %v3389_v57 }
 0x179   : > { %3499 = vpow2.f32 %v2784_v59  ;;  %v2786_v5 = vmul.f32 -1.442695, %v3405_v1 }
 0x17a   : > { %3501 = vpow2.f32 %v2785_v49 }
 0x17b   : > { %3503 = vpow2.f32 %v2786_v5 }
 0x17c   : > { %3505 = vtanh.f32 %v3404_v8 }
 0x183   : > { %v3500_v9 = vpop.eup %3499 }
 0x184   : > { %v3502_v12 = vpop.eup %3501  ;;  %v918_v14 = vadd.f32 1.0, %v3500_v9 }
 0x185   : > { %v924_v16 = vadd.f32 1.0, %v3502_v12  ;;  %v3504_v19 = vpop.eup %3503 }
 0x186   : > { %3507 = vrcp.f32 %v918_v14  ;;  %v3506_v20 = vpop.eup %3505  ;;  %v931_v29 = vadd.f32 1.0, %v3504_v19 }
 0x187   : > { %3509 = vrcp.f32 %v924_v16 }
 0x188   : > { %3511 = vrcp.f32 %v931_v29 }
 0x190   : > { %v3508_v23 = vpop.eup %3507 }
 0x191   : > { %v3510_v25 = vpop.eup %3509  ;;  %v935_v28 = vmul.f32 %v3508_v23, %v3506_v20  ;;  %v1428_v23 = vld [vmem:[%s3912_s11 + $0x8] sm:$0xff] }
 0x192   : > { %v934_v32 = vmul.f32 0.0, %v3510_v25  ;;  %v3512_v38 = vpop.eup %3511  ;;  %v1432_v25 = vld [vmem:[%s3912_s11 + $0x28] sm:$0xff] }
 0x193   : > { %v4301_v29 = vpack.c.bf16 %v1432_v25, %v1428_v23  ;;  %v1686_v23 = vld [vmem:[%s3912_s11 + $0x90] sm:$0xff] }
 0x194   : > { %v4253_v36 = vadd.f32 %v935_v28, %v934_v32  ;;  %v1430_v28 = vld [vmem:[%s3912_s11 + $0x18] sm:$0xff]  ;;  %v1690_v25 = vld [vmem:[%s3912_s11 + $0xb0] sm:$0xff] }
 0x195   : > { %v1434_v32 = vld [vmem:[%s3912_s11 + $0x38] sm:$0xff] }
 0x196   : > { %3513 = vtanh.f32 %v4253_v36 }
 0x1a0   : > { %v3514_v39 = vpop.eup %3513 }
 0x1a1   : > { %v938_v41 = vmul.f32 %v3514_v39, %v3512_v38  ;;  %v1431_v38 = vld [vmem:[%s3912_s11 + $0x20] sm:$0xff]  ;;  %v4306_v39 = vpack.c.bf16 %v1434_v32, %v1430_v28  ;;  %v4395_v28 = vpack.c.bf16 %v1690_v25, %v1686_v23  ;;  %v1693_v32 = vld [vmem:[%s3912_s11 + $0xc8] sm:$0xff]  ;;  %v1718_v23 = vld [vmem:[%s3912_s11 + $0x190] sm:$0xff] }
 0x1a3   : > { %939 = vst [vmem:[#allocation2] sm:$0xff] %v938_v41  ;;  %1074 = vmatmul.mubr.f32.vlgmr.msra.gmra.mrb[2].mxu0 %v938_v41  ;;  %1145 = vmatmul.mubr.f32.vlgmr.msra.gmra.mrb[2].mxu1 %v938_v41 }
 0x1a4   : > { %3007 = vmatpush1.bf16.msra.mxu0 %v4040_v55  ;;  %3039 = vmatpush1.bf16.msra.mxu1 %v4045_v58 }
 0x1a5   : > { %3009 = vmatprep.subr.bf16.mxu0 %v4050_v61  ;;  %3041 = vmatprep.subr.bf16.mxu1 %v4054_v0 }
 0x1a6   : > { %1314 = vmatprep.mubr.f32.mxu0 %v3733_v15  ;;  %1385 = vmatprep.mubr.f32.mxu1 %v3733_v15 }
 0x1a8   : > { %3011 = vmatpush1.bf16.msra.mxu0 %v4059_v4  ;;  %3043 = vmatpush1.bf16.msra.mxu1 %v4065_v7 }
 0x1a9   : > { %3013 = vmatprep.subr.bf16.mxu0 %v4071_v10  ;;  %3045 = vmatprep.subr.bf16.mxu1 %v4076_v13 }
 0x1ac   : > { %3015 = vmatpush1.bf16.msra.mxu0 %v4081_v18  ;;  %3047 = vmatpush1.bf16.msra.mxu1 %v4087_v21 }
 0x1ad   : > { %3017 = vmatprep.subr.bf16.mxu0 %v4093_v24  ;;  %3049 = vmatprep.subr.bf16.mxu1 %v4098_v27 }
 0x1b0   : > { %3019 = vmatpush1.bf16.msra.mxu0 %v4103_v31  ;;  %3051 = vmatpush1.bf16.msra.mxu1 %v4109_v34 }
 0x1b1   : > { %3021 = vmatprep.subr.bf16.mxu0 %v4115_v37  ;;  %3053 = vmatprep.subr.bf16.mxu1 %v4120_v40 }
 0x1b4   : > { %3023 = vmatpush1.bf16.msra.mxu0 %v4125_v44  ;;  %3055 = vmatpush1.bf16.msra.mxu1 %v4131_v48 }
 0x1b5   : > { %3025 = vmatprep.subr.bf16.mxu0 %v4137_v52  ;;  %3057 = vmatprep.subr.bf16.mxu1 %v4142_v56 }
 0x1b8   : > { %3027 = vmatpush1.bf16.msra.mxu0 %v4147_v62  ;;  %3059 = vmatpush1.bf16.msra.mxu1 %v4153_v2 }
 0x1b9   : > { %3029 = vmatprep.subr.bf16.mxu0 %v4159_v6  ;;  %3061 = vmatprep.subr.bf16.mxu1 %v4164_v11 }
 0x1bc   : > { %3031 = vmatpush1.bf16.msra.mxu0 %v4169_v17  ;;  %3063 = vmatpush1.bf16.msra.mxu1 %v4175_v22 }
 0x1bd   : > { %3033 = vmatprep.subr.bf16.mxu0 %v4181_v26  ;;  %3065 = vmatprep.subr.bf16.mxu1 %v4186_v30 }
 0x1c0   : > { %3035 = vmatpush1.bf16.msra.mxu0 %v4189_v33  ;;  %3067 = vmatpush1.bf16.msra.mxu1 %v4193_v35 }
 0x1c1   : > { %3069 = vmatprep.subr.bf16.mxu0 %v4301_v29  ;;  %3101 = vmatprep.subr.bf16.mxu1 %v4306_v39 }
 0x276   : > { %v1075_v55 = vpop.f32.mrb[2].mxu0  ;;  %v1146_v58 = vpop.f32.mrb[2].mxu1 }
 0x277   : > { %v3390_v61 = vadd.f32 %v1075_v55, %v4241_v43  ;;  %v1077_v0 = vpop.f32.mrb[3].mxu0  ;;  %v1148_v4 = vpop.f32.mrb[3].mxu1  ;;  %v3406_v53 = vadd.f32 %v1146_v58, %v4250_v3  ;;  %v1429_v55 = vld [vmem:[%s3912_s11 + $0x10] sm:$0xff] }
 0x278   : > { %v3391_v7 = vadd.f32 %v1077_v0, %v4243_v45  ;;  %v3407_v50 = vadd.f32 %v1148_v4, %v4247_v60  ;;  %v1433_v58 = vld [vmem:[%s3912_s11 + $0x30] sm:$0xff]  ;;  %v1436_v0 = vld [vmem:[%s3912_s11 + $0x48] sm:$0xff] }
 0x279   : > { %v2787_v42 = vmul.f32 -1.442695, %v3390_v61  ;;  %v4313_v61 = vpack.c.bf16 %v1433_v58, %v1429_v55  ;;  %v1440_v4 = vld [vmem:[%s3912_s11 + $0x68] sm:$0xff]  ;;  %v1699_v58 = vld [vmem:[%s3912_s11 + $0xf8] sm:$0xff] }
 0x27a   : > { %v2788_v47 = vmul.f32 -1.442695, %v3391_v7  ;;  %v2789_v51 = vmul.f32 -1.442695, %v3407_v50  ;;  %v1438_v7 = vld [vmem:[%s3912_s11 + $0x58] sm:$0xff]  ;;  %v1435_v50 = vld [vmem:[%s3912_s11 + $0x40] sm:$0xff] }
 0x27b   : > { %3515 = vpow2.f32 %v2787_v42  ;;  %v4321_v42 = vpack.c.bf16 %v1440_v4, %v1436_v0  ;;  %v1692_v0 = vld [vmem:[%s3912_s11 + $0xc0] sm:$0xff] }
 0x27c   : > { %3517 = vpow2.f32 %v2788_v47  ;;  %v1442_v47 = vld [vmem:[%s3912_s11 + $0x78] sm:$0xff]  ;;  %v1696_v4 = vld [vmem:[%s3912_s11 + $0xe0] sm:$0xff] }
 0x27d   : > { %3519 = vpow2.f32 %v2789_v51  ;;  %v1439_v51 = vld [vmem:[%s3912_s11 + $0x60] sm:$0xff] }
 0x27e   : > { %3521 = vtanh.f32 %v3406_v53  ;;  %v4326_v53 = vpack.c.bf16 %v1442_v47, %v1438_v7  ;;  %v4410_v47 = vpack.c.bf16 %v1696_v4, %v1692_v0  ;;  %v1727_v4 = vld [vmem:[%s3912_s11 + $0x1d8] sm:$0xff] }
 0x285   : > { %v3516_v54 = vpop.eup %3515 }
 0x286   : > { %v3518_v57 = vpop.eup %3517  ;;  %v1158_v46 = vadd.f32 1.0, %v3516_v54  ;;  %v4328_v54 = vpack.c.bf16 %v1439_v51, %v1435_v50  ;;  %v1694_v50 = vld [vmem:[%s3912_s11 + $0xd0] sm:$0xff] }
 0x287   : > { %v1164_v59 = vadd.f32 1.0, %v3518_v57  ;;  %v3520_v49 = vpop.eup %3519  ;;  %v1437_v57 = vld [vmem:[%s3912_s11 + $0x50] sm:$0xff] }
 0x288   : > { %3523 = vrcp.f32 %v1158_v46  ;;  %v3522_v63 = vpop.eup %3521  ;;  %v1171_v9 = vadd.f32 1.0, %v3520_v49  ;;  %v1441_v46 = vld [vmem:[%s3912_s11 + $0x70] sm:$0xff] }
 0x289   : > { %3525 = vrcp.f32 %v1164_v59  ;;  %v4333_v59 = vpack.c.bf16 %v1441_v46, %v1437_v57  ;;  %v1698_v51 = vld [vmem:[%s3912_s11 + $0xf0] sm:$0xff]  ;;  %v1701_v46 = vld [vmem:[%s3912_s11 + $0x108] sm:$0xff] }
 0x28a   : > { %3527 = vrcp.f32 %v1171_v9  ;;  %v4415_v57 = vpack.c.bf16 %v1698_v51, %v1694_v50  ;;  %v1731_v50 = vld [vmem:[%s3912_s11 + $0x1f8] sm:$0xff]  ;;  %v1724_v51 = vld [vmem:[%s3912_s11 + $0x1c0] sm:$0xff] }
 0x292   : > { %v3524_v1 = vpop.eup %3523 }
 0x293   : > { %v3526_v5 = vpop.eup %3525  ;;  %v1175_v8 = vmul.f32 %v3524_v1, %v3522_v63  ;;  %v1685_v1 = vld [vmem:[%s3912_s11 + $0x88] sm:$0xff] }
 0x294   : > { %v1174_v12 = vmul.f32 %v3526_v5, %v4253_v36  ;;  %v3528_v16 = vpop.eup %3527  ;;  %v1427_v36 = vld [vmem:[%s3912_s11] sm:$0xff]  ;;  %v1689_v5 = vld [vmem:[%s3912_s11 + $0xa8] sm:$0xff] }
 0x295   : > { %v4308_v41 = vpack.c.bf16 %v1431_v38, %v1427_v36  ;;  %v4383_v9 = vpack.c.bf16 %v1689_v5, %v1685_v1  ;;  %v1697_v36 = vld [vmem:[%s3912_s11 + $0xe8] sm:$0xff]  ;;  %v1695_v38 = vld [vmem:[%s3912_s11 + $0xd8] sm:$0xff] }
 0x296   : > { %v4293_v14 = vadd.f32 %v1175_v8, %v1174_v12  ;;  %v1687_v8 = vld [vmem:[%s3912_s11 + $0x98] sm:$0xff]  ;;  %v4403_v55 = vpack.c.bf16 %v1697_v36, %v1693_v32  ;;  %v4408_v7 = vpack.c.bf16 %v1699_v58, %v1695_v38  ;;  %v1722_v32 = vld [vmem:[%s3912_s11 + $0x1b0] sm:$0xff]  ;;  %v1725_v36 = vld [vmem:[%s3912_s11 + $0x1c8] sm:$0xff] }
 0x297   : > { %v1691_v12 = vld [vmem:[%s3912_s11 + $0xb8] sm:$0xff]  ;;  %v1729_v38 = vld [vmem:[%s3912_s11 + $0x1e8] sm:$0xff]  ;;  %v4477_v58 = vpack.c.bf16 %v1722_v32, %v1718_v23 }
 0x298   : > { %3529 = vtanh.f32 %v4293_v14  ;;  %v1719_v1 = vld [vmem:[%s3912_s11 + $0x198] sm:$0xff]  ;;  %v4479_v0 = vpack.c.bf16 %v1729_v38, %v1725_v36 }
 0x299   : > { %v1723_v5 = vld [vmem:[%s3912_s11 + $0x1b8] sm:$0xff] }
 0x2a2   : > { %v3530_v19 = vpop.eup %3529 }
 0x2a3   : > { %v1178_v20 = vmul.f32 %v3530_v19, %v3528_v16  ;;  %v1688_v16 = vld [vmem:[%s3912_s11 + $0xa0] sm:$0xff]  ;;  %v4388_v19 = vpack.c.bf16 %v1691_v12, %v1687_v8  ;;  %v4464_v12 = vpack.c.bf16 %v1723_v5, %v1719_v1 }
 0x2a5   : > { %1180 = vst [vmem:[#allocation2 + $0x8] sm:$0xff] %v1178_v20  ;;  %1315 = vmatmul.mubr.f32.vlgmr.msra.gmra.mrb[4].mxu0 %v1178_v20  ;;  %1386 = vmatmul.mubr.f32.vlgmr.msra.gmra.mrb[4].mxu1 %v1178_v20 }
 0x2a6   : > { %1555 = vmatprep.mubr.f32.mxu0 %v3733_v15  ;;  %1626 = vmatprep.mubr.f32.mxu1 %v3733_v15 }
 0x2a7   : > { %3071 = vmatpush1.bf16.msra.mxu0 %v4308_v41  ;;  %3103 = vmatpush1.bf16.msra.mxu1 %v4313_v61 }
 0x2a8   : > { %3073 = vmatprep.subr.bf16.mxu0 %v4321_v42  ;;  %3105 = vmatprep.subr.bf16.mxu1 %v4326_v53 }
 0x2ab   : > { %3075 = vmatpush1.bf16.msra.mxu0 %v4328_v54  ;;  %3107 = vmatpush1.bf16.msra.mxu1 %v4333_v59 }
 0x2ac   : > { %3077 = vmatprep.subr.bf16.mxu0 %v4071_v10  ;;  %3109 = vmatprep.subr.bf16.mxu1 %v4076_v13 }
 0x2af   : > { %3079 = vmatpush1.bf16.msra.mxu0 %v4081_v18  ;;  %3111 = vmatpush1.bf16.msra.mxu1 %v4087_v21 }
 0x2b0   : > { %3081 = vmatprep.subr.bf16.mxu0 %v4093_v24  ;;  %3113 = vmatprep.subr.bf16.mxu1 %v4098_v27 }
 0x2b3   : > { %3083 = vmatpush1.bf16.msra.mxu0 %v4103_v31  ;;  %3115 = vmatpush1.bf16.msra.mxu1 %v4109_v34 }
 0x2b4   : > { %3085 = vmatprep.subr.bf16.mxu0 %v4115_v37  ;;  %3117 = vmatprep.subr.bf16.mxu1 %v4120_v40 }
 0x2b7   : > { %3087 = vmatpush1.bf16.msra.mxu0 %v4125_v44  ;;  %3119 = vmatpush1.bf16.msra.mxu1 %v4131_v48 }
 0x2b8   : > { %3089 = vmatprep.subr.bf16.mxu0 %v4137_v52  ;;  %3121 = vmatprep.subr.bf16.mxu1 %v4142_v56 }
 0x2bb   : > { %3091 = vmatpush1.bf16.msra.mxu0 %v4147_v62  ;;  %3123 = vmatpush1.bf16.msra.mxu1 %v4153_v2 }
 0x2bc   : > { %3093 = vmatprep.subr.bf16.mxu0 %v4159_v6  ;;  %3125 = vmatprep.subr.bf16.mxu1 %v4164_v11 }
 0x2bf   : > { %3095 = vmatpush1.bf16.msra.mxu0 %v4169_v17  ;;  %3127 = vmatpush1.bf16.msra.mxu1 %v4175_v22 }
 0x2c0   : > { %3097 = vmatprep.subr.bf16.mxu0 %v4181_v26  ;;  %3129 = vmatprep.subr.bf16.mxu1 %v4186_v30 }
 0x2c3   : > { %3099 = vmatpush1.bf16.msra.mxu0 %v4189_v33  ;;  %3131 = vmatpush1.bf16.msra.mxu1 %v4193_v35 }
 0x2c4   : > { %3133 = vmatprep.subr.bf16.mxu0 %v4301_v29  ;;  %3165 = vmatprep.subr.bf16.mxu1 %v4306_v39 }
 0x378   : > { %v1316_v10 = vpop.f32.mrb[4].mxu0  ;;  %v1387_v13 = vpop.f32.mrb[4].mxu1 }
 0x379   : > { %v3392_v18 = vadd.f32 %v1316_v10, %v4241_v43  ;;  %v1318_v21 = vpop.f32.mrb[5].mxu0  ;;  %v1389_v24 = vpop.f32.mrb[5].mxu1  ;;  %v3408_v44 = vadd.f32 %v1387_v13, %v4250_v3  ;;  %v1705_v10 = vld [vmem:[%s3912_s11 + $0x128] sm:$0xff]  ;;  %v1703_v13 = vld [vmem:[%s3912_s11 + $0x118] sm:$0xff] }
 0x37a   : > { %v3393_v27 = vadd.f32 %v1318_v21, %v4243_v45  ;;  %v3409_v37 = vadd.f32 %v1389_v24, %v4247_v60  ;;  %v1707_v21 = vld [vmem:[%s3912_s11 + $0x138] sm:$0xff]  ;;  %v1700_v24 = vld [vmem:[%s3912_s11 + $0x100] sm:$0xff] }
 0x37b   : > { %v2790_v31 = vmul.f32 -1.442695, %v3392_v18  ;;  %v4423_v18 = vpack.c.bf16 %v1705_v10, %v1701_v46  ;;  %v4485_v46 = vpack.c.bf16 %v1731_v50, %v1727_v4  ;;  %v1728_v10 = vld [vmem:[%s3912_s11 + $0x1e0] sm:$0xff] }
 0x37c   : > { %v2791_v34 = vmul.f32 -1.442695, %v3393_v27  ;;  %v2792_v40 = vmul.f32 -1.442695, %v3409_v37  ;;  %v1704_v27 = vld [vmem:[%s3912_s11 + $0x120] sm:$0xff]  ;;  %v1702_v37 = vld [vmem:[%s3912_s11 + $0x110] sm:$0xff] }
 0x37d   : > { %3531 = vpow2.f32 %v2790_v31  ;;  %v4428_v31 = vpack.c.bf16 %v1707_v21, %v1703_v13  ;;  %v1726_v13 = vld [vmem:[%s3912_s11 + $0x1d0] sm:$0xff] }
 0x37e   : > { %3533 = vpow2.f32 %v2791_v34  ;;  %v4430_v34 = vpack.c.bf16 %v1704_v27, %v1700_v24  ;;  %v1730_v21 = vld [vmem:[%s3912_s11 + $0x1f0] sm:$0xff]  ;;  %v4491_v24 = vpack.c.bf16 %v1728_v10, %v1724_v51 }
 0x37f   : > { %3535 = vpow2.f32 %v2792_v40  ;;  %v1706_v40 = vld [vmem:[%s3912_s11 + $0x130] sm:$0xff]  ;;  %v4495_v27 = vpack.c.bf16 %v1730_v21, %v1726_v13 }
 0x380   : > { %3537 = vtanh.f32 %v3408_v44  ;;  %v4435_v44 = vpack.c.bf16 %v1706_v40, %v1702_v37 }
 0x387   : > { %v3532_v48 = vpop.eup %3531 }
 0x388   : > { %v3534_v52 = vpop.eup %3533  ;;  %v1399_v56 = vadd.f32 1.0, %v3532_v48  ;;  %v1709_v48 = vld [vmem:[%s3912_s11 + $0x148] sm:$0xff] }
 0x389   : > { %v1405_v62 = vadd.f32 1.0, %v3534_v52  ;;  %v3536_v2 = vpop.eup %3535  ;;  %v1713_v52 = vld [vmem:[%s3912_s11 + $0x168] sm:$0xff] }
 0x38a   : > { %3539 = vrcp.f32 %v1399_v56  ;;  %v3538_v6 = vpop.eup %3537  ;;  %v1412_v26 = vadd.f32 1.0, %v3536_v2  ;;  %v1711_v56 = vld [vmem:[%s3912_s11 + $0x158] sm:$0xff] }
 0x38b   : > { %3541 = vrcp.f32 %v1405_v62  ;;  %v4442_v62 = vpack.c.bf16 %v1713_v52, %v1709_v48  ;;  %v1715_v2 = vld [vmem:[%s3912_s11 + $0x178] sm:$0xff] }
 0x38c   : > { %3543 = vrcp.f32 %v1412_v26  ;;  %v1710_v26 = vld [vmem:[%s3912_s11 + $0x150] sm:$0xff] }
 0x394   : > { %v3540_v11 = vpop.eup %3539 }
 0x395   : > { %v3542_v17 = vpop.eup %3541  ;;  %v1416_v22 = vmul.f32 %v3540_v11, %v3538_v6  ;;  %v1708_v6 = vld [vmem:[%s3912_s11 + $0x140] sm:$0xff] }
 0x396   : > { %v1415_v30 = vmul.f32 %v3542_v17, %v4293_v14  ;;  %v3544_v35 = vpop.eup %3543  ;;  %v1684_v14 = vld [vmem:[%s3912_s11 + $0x80] sm:$0xff]  ;;  %v4448_v17 = vpack.c.bf16 %v1715_v2, %v1711_v56 }
 0x397   : > { %v4390_v20 = vpack.c.bf16 %v1688_v16, %v1684_v14  ;;  %v1712_v11 = vld [vmem:[%s3912_s11 + $0x160] sm:$0xff] }
 0x398   : > { %v4369_v33 = vadd.f32 %v1416_v22, %v1415_v30  ;;  %v4450_v22 = vpack.c.bf16 %v1712_v11, %v1708_v6  ;;  %v1714_v30 = vld [vmem:[%s3912_s11 + $0x170] sm:$0xff]  ;;  %v1716_v14 = vld [vmem:[%s3912_s11 + $0x180] sm:$0xff] }
 0x399   : > { %v1720_v16 = vld [vmem:[%s3912_s11 + $0x1a0] sm:$0xff] }
 0x39a   : > { %3545 = vtanh.f32 %v4369_v33  ;;  %v4470_v25 = vpack.c.bf16 %v1720_v16, %v1716_v14 }
 0x3a4   : > { %v3546_v49 = vpop.eup %3545 }
 0x3a5   : > { %v1419_v63 = vmul.f32 %v3546_v49, %v3544_v35  ;;  %v1717_v35 = vld [vmem:[%s3912_s11 + $0x188] sm:$0xff]  ;;  %v4456_v49 = vpack.c.bf16 %v1714_v30, %v1710_v26 }
 0x3a7   : > { %1421 = vst [vmem:[#allocation2 + $0x10] sm:$0xff] %v1419_v63  ;;  %1556 = vmatmul.mubr.f32.vlgmr.msra.gmra.mrb[6].mxu0 %v1419_v63  ;;  %1627 = vmatmul.mubr.f32.vlgmr.msra.gmra.mrb[6].mxu1 %v1419_v63  ;;  %v1721_v63 = vld [vmem:[%s3912_s11 + $0x1a8] sm:$0xff] }
 0x3a8   : > { %3135 = vmatpush1.bf16.msra.mxu0 %v4308_v41  ;;  %3167 = vmatpush1.bf16.msra.mxu1 %v4313_v61  ;;  %v4462_v8 = vpack.c.bf16 %v1721_v63, %v1717_v35 }
 0x3a9   : > { %3137 = vmatprep.subr.bf16.mxu0 %v4321_v42  ;;  %3169 = vmatprep.subr.bf16.mxu1 %v4326_v53 }
 0x3aa   : > { %1796 = vmatprep.mubr.f32.mxu0 %v3733_v15  ;;  %1867 = vmatprep.mubr.f32.mxu1 %v3733_v15 }
 0x3ac   : > { %3139 = vmatpush1.bf16.msra.mxu0 %v4328_v54  ;;  %3171 = vmatpush1.bf16.msra.mxu1 %v4333_v59 }
 0x3ad   : > { %3141 = vmatprep.subr.bf16.mxu0 %v4383_v9  ;;  %3173 = vmatprep.subr.bf16.mxu1 %v4388_v19 }
 0x3b0   : > { %3143 = vmatpush1.bf16.msra.mxu0 %v4390_v20  ;;  %3175 = vmatpush1.bf16.msra.mxu1 %v4395_v28 }
 0x3b1   : > { %3145 = vmatprep.subr.bf16.mxu0 %v4403_v55  ;;  %3177 = vmatprep.subr.bf16.mxu1 %v4408_v7 }
 0x3b4   : > { %3147 = vmatpush1.bf16.msra.mxu0 %v4410_v47  ;;  %3179 = vmatpush1.bf16.msra.mxu1 %v4415_v57 }
 0x3b5   : > { %3149 = vmatprep.subr.bf16.mxu0 %v4423_v18  ;;  %3181 = vmatprep.subr.bf16.mxu1 %v4428_v31 }
 0x3b8   : > { %3151 = vmatpush1.bf16.msra.mxu0 %v4430_v34  ;;  %3183 = vmatpush1.bf16.msra.mxu1 %v4435_v44 }
 0x3b9   : > { %3153 = vmatprep.subr.bf16.mxu0 %v4442_v62  ;;  %3185 = vmatprep.subr.bf16.mxu1 %v4448_v17 }
 0x3bc   : > { %3155 = vmatpush1.bf16.msra.mxu0 %v4450_v22  ;;  %3187 = vmatpush1.bf16.msra.mxu1 %v4456_v49 }
 0x3bd   : > { %3157 = vmatprep.subr.bf16.mxu0 %v4462_v8  ;;  %3189 = vmatprep.subr.bf16.mxu1 %v4464_v12 }
 0x3c0   : > { %3159 = vmatpush1.bf16.msra.mxu0 %v4470_v25  ;;  %3191 = vmatpush1.bf16.msra.mxu1 %v4477_v58 }
 0x3c1   : > { %3161 = vmatprep.subr.bf16.mxu0 %v4479_v0  ;;  %3193 = vmatprep.subr.bf16.mxu1 %v4485_v46 }
 0x3c4   : > { %3163 = vmatpush1.bf16.msra.mxu0 %v4491_v24  ;;  %3195 = vmatpush1.bf16.msra.mxu1 %v4495_v27 }
 0x3c5   : > { %3197 = vmatprep.subr.bf16.mxu0 %v4301_v29  ;;  %3229 = vmatprep.subr.bf16.mxu1 %v4306_v39 }
 0x47a   : > { %v1557_v37 = vpop.f32.mrb[6].mxu0  ;;  %v1628_v40 = vpop.f32.mrb[6].mxu1 }
 0x47b   : > { %v3394_v48 = vadd.f32 %v1557_v37, %v4241_v43  ;;  %v1559_v52 = vpop.f32.mrb[7].mxu0  ;;  %v1630_v56 = vpop.f32.mrb[7].mxu1  ;;  %v3410_v35 = vadd.f32 %v1628_v40, %v4250_v3 }
 0x47c   : > { %v3395_v2 = vadd.f32 %v1559_v52, %v4243_v45  ;;  %v3411_v26 = vadd.f32 %v1630_v56, %v4247_v60 }
 0x47d   : > { %v2793_v6 = vmul.f32 -1.442695, %v3394_v48 }
 0x47e   : > { %v2794_v11 = vmul.f32 -1.442695, %v3395_v2  ;;  %v2795_v30 = vmul.f32 -1.442695, %v3411_v26 }
 0x47f   : > { %3547 = vpow2.f32 %v2793_v6 }
 0x480   : > { %3549 = vpow2.f32 %v2794_v11 }
 0x481   : > { %3551 = vpow2.f32 %v2795_v30 }
 0x482   : > { %3553 = vtanh.f32 %v3410_v35 }
 0x489   : > { %v3548_v63 = vpop.eup %3547 }
 0x48a   : > { %v3550_v1 = vpop.eup %3549  ;;  %v1640_v5 = vadd.f32 1.0, %v3548_v63 }
 0x48b   : > { %v1646_v14 = vadd.f32 1.0, %v3550_v1  ;;  %v3552_v16 = vpop.eup %3551 }
 0x48c   : > { %3555 = vrcp.f32 %v1640_v5  ;;  %v3554_v23 = vpop.eup %3553  ;;  %v1653_v4 = vadd.f32 1.0, %v3552_v16 }
 0x48d   : > { %3557 = vrcp.f32 %v1646_v14 }
 0x48e   : > { %3559 = vrcp.f32 %v1653_v4 }
 0x496   : > { %v3556_v32 = vpop.eup %3555 }
 0x497   : > { %v3558_v36 = vpop.eup %3557  ;;  %v1657_v38 = vmul.f32 %v3556_v32, %v3554_v23 }
 0x498   : > { %v1656_v50 = vmul.f32 %v3558_v36, %v4369_v33  ;;  %v3560_v10 = vpop.eup %3559 }
 0x49a   : > { %v4507_v51 = vadd.f32 %v1657_v38, %v1656_v50 }
 0x49c   : > { %3561 = vtanh.f32 %v4507_v51 }
 0x4a6   : > { %v3562_v13 = vpop.eup %3561 }
 0x4a7   : > { %v1660_v21 = vmul.f32 %v3562_v13, %v3560_v10 }
 0x4a9   : > { %1662 = vst [vmem:[#allocation2 + $0x18] sm:$0xff] %v1660_v21  ;;  %1797 = vmatmul.mubr.f32.vlgmr.msra.gmra.mrb[8].mxu0 %v1660_v21  ;;  %1868 = vmatmul.mubr.f32.vlgmr.msra.gmra.mrb[8].mxu1 %v1660_v21 }
 0x4aa   : > { %3199 = vmatpush1.bf16.msra.mxu0 %v4308_v41  ;;  %3231 = vmatpush1.bf16.msra.mxu1 %v4313_v61 }
 0x4ab   : > { %3201 = vmatprep.subr.bf16.mxu0 %v4321_v42  ;;  %3233 = vmatprep.subr.bf16.mxu1 %v4326_v53 }
 0x4ac   : > { %2037 = vmatprep.mubr.f32.mxu0 %v3733_v15  ;;  %2108 = vmatprep.mubr.f32.mxu1 %v3733_v15 }
 0x4ae   : > { %3203 = vmatpush1.bf16.msra.mxu0 %v4328_v54  ;;  %3235 = vmatpush1.bf16.msra.mxu1 %v4333_v59 }
 0x4af   : > { %3205 = vmatprep.subr.bf16.mxu0 %v4383_v9  ;;  %3237 = vmatprep.subr.bf16.mxu1 %v4388_v19 }
 0x4b2   : > { %3207 = vmatpush1.bf16.msra.mxu0 %v4390_v20  ;;  %3239 = vmatpush1.bf16.msra.mxu1 %v4395_v28 }
 0x4b3   : > { %3209 = vmatprep.subr.bf16.mxu0 %v4403_v55  ;;  %3241 = vmatprep.subr.bf16.mxu1 %v4408_v7 }
 0x4b6   : > { %3211 = vmatpush1.bf16.msra.mxu0 %v4410_v47  ;;  %3243 = vmatpush1.bf16.msra.mxu1 %v4415_v57 }
 0x4b7   : > { %3213 = vmatprep.subr.bf16.mxu0 %v4423_v18  ;;  %3245 = vmatprep.subr.bf16.mxu1 %v4428_v31 }
 0x4ba   : > { %3215 = vmatpush1.bf16.msra.mxu0 %v4430_v34  ;;  %3247 = vmatpush1.bf16.msra.mxu1 %v4435_v44 }
 0x4bb   : > { %3217 = vmatprep.subr.bf16.mxu0 %v4442_v62  ;;  %3249 = vmatprep.subr.bf16.mxu1 %v4448_v17 }
 0x4be   : > { %3219 = vmatpush1.bf16.msra.mxu0 %v4450_v22  ;;  %3251 = vmatpush1.bf16.msra.mxu1 %v4456_v49 }
 0x4bf   : > { %3221 = vmatprep.subr.bf16.mxu0 %v4462_v8  ;;  %3253 = vmatprep.subr.bf16.mxu1 %v4464_v12 }
 0x4c2   : > { %3223 = vmatpush1.bf16.msra.mxu0 %v4470_v25  ;;  %3255 = vmatpush1.bf16.msra.mxu1 %v4477_v58 }
 0x4c3   : > { %3225 = vmatprep.subr.bf16.mxu0 %v4479_v0  ;;  %3257 = vmatprep.subr.bf16.mxu1 %v4485_v46 }
 0x4c6   : > { %3227 = vmatpush1.bf16.msra.mxu0 %v4491_v24  ;;  %3259 = vmatpush1.bf16.msra.mxu1 %v4495_v27 }
 0x4c7   : > { %3261 = vmatprep.subr.bf16.mxu0 %v4301_v29  ;;  %3293 = vmatprep.subr.bf16.mxu1 %v4306_v39 }
 0x57c   : > { %v1798_v33 = vpop.f32.mrb[8].mxu0  ;;  %v1869_v37 = vpop.f32.mrb[8].mxu1 }
 0x57d   : > { %v3396_v40 = vadd.f32 %v1798_v33, %v4241_v43  ;;  %v1800_v48 = vpop.f32.mrb[9].mxu0  ;;  %v1871_v52 = vpop.f32.mrb[9].mxu1  ;;  %v3412_v30 = vadd.f32 %v1869_v37, %v4250_v3 }
 0x57e   : > { %v3397_v56 = vadd.f32 %v1800_v48, %v4243_v45  ;;  %v3413_v11 = vadd.f32 %v1871_v52, %v4247_v60 }
 0x57f   : > { %v2796_v2 = vmul.f32 -1.442695, %v3396_v40 }
 0x580   : > { %v2797_v6 = vmul.f32 -1.442695, %v3397_v56  ;;  %v2798_v26 = vmul.f32 -1.442695, %v3413_v11 }
 0x581   : > { %3563 = vpow2.f32 %v2796_v2 }
 0x582   : > { %3565 = vpow2.f32 %v2797_v6 }
 0x583   : > { %3567 = vpow2.f32 %v2798_v26 }
 0x584   : > { %3569 = vtanh.f32 %v3412_v30 }
 0x58b   : > { %v3564_v29 = vpop.eup %3563 }
 0x58c   : > { %v3566_v35 = vpop.eup %3565  ;;  %v1881_v39 = vadd.f32 1.0, %v3564_v29 }
 0x58d   : > { %v1887_v63 = vadd.f32 1.0, %v3566_v35  ;;  %v3568_v1 = vpop.eup %3567 }
 0x58e   : > { %3571 = vrcp.f32 %v1881_v39  ;;  %v3570_v5 = vpop.eup %3569  ;;  %v1894_v32 = vadd.f32 1.0, %v3568_v1 }
 0x58f   : > { %3573 = vrcp.f32 %v1887_v63 }
 0x590   : > { %3575 = vrcp.f32 %v1894_v32 }
 0x598   : > { %v3572_v14 = vpop.eup %3571 }
 0x599   : > { %v3574_v16 = vpop.eup %3573  ;;  %v1898_v23 = vmul.f32 %v3572_v14, %v3570_v5  ;;  %v2392_v14 = vld [vmem:[%s3912_s11 + $0x8] sm:$0xff] }
 0x59a   : > { %v1897_v36 = vmul.f32 %v3574_v16, %v4507_v51  ;;  %v3576_v4 = vpop.eup %3575  ;;  %v2396_v16 = vld [vmem:[%s3912_s11 + $0x28] sm:$0xff] }
 0x59b   : > { %v3324_v32 = vpack.c.bf16 %v2396_v16, %v2392_v14 }
 0x59c   : > { %v4549_v38 = vadd.f32 %v1898_v23, %v1897_v36  ;;  %v2394_v23 = vld [vmem:[%s3912_s11 + $0x18] sm:$0xff] }
 0x59d   : > { %v2398_v36 = vld [vmem:[%s3912_s11 + $0x38] sm:$0xff] }
 0x59e   : > { %3577 = vtanh.f32 %v4549_v38 }
 0x5a8   : > { %v3578_v50 = vpop.eup %3577 }
 0x5a9   : > { %v1901_v10 = vmul.f32 %v3578_v50, %v3576_v4  ;;  %v2395_v4 = vld [vmem:[%s3912_s11 + $0x20] sm:$0xff]  ;;  %v3356_v50 = vpack.c.bf16 %v2398_v36, %v2394_v23 }
 0x5ab   : > { %1903 = vst [vmem:[#allocation2 + $0x20] sm:$0xff] %v1901_v10  ;;  %2038 = vmatmul.mubr.f32.vlgmr.msra.gmra.mrb[10].mxu0 %v1901_v10  ;;  %2109 = vmatmul.mubr.f32.vlgmr.msra.gmra.mrb[10].mxu1 %v1901_v10 }
 0x5ac   : > { %3263 = vmatpush1.bf16.msra.mxu0 %v4308_v41  ;;  %3295 = vmatpush1.bf16.msra.mxu1 %v4313_v61 }
 0x5ad   : > { %3265 = vmatprep.subr.bf16.mxu0 %v4321_v42  ;;  %3297 = vmatprep.subr.bf16.mxu1 %v4326_v53 }
 0x5ae   : > { %2278 = vmatprep.mubr.f32.mxu0 %v3733_v15  ;;  %2349 = vmatprep.mubr.f32.mxu1 %v3733_v15 }
 0x5b0   : > { %3267 = vmatpush1.bf16.msra.mxu0 %v4328_v54  ;;  %3299 = vmatpush1.bf16.msra.mxu1 %v4333_v59 }
 0x5b1   : > { %3269 = vmatprep.subr.bf16.mxu0 %v4383_v9  ;;  %3301 = vmatprep.subr.bf16.mxu1 %v4388_v19 }
 0x5b4   : > { %3271 = vmatpush1.bf16.msra.mxu0 %v4390_v20  ;;  %3303 = vmatpush1.bf16.msra.mxu1 %v4395_v28 }
 0x5b5   : > { %3273 = vmatprep.subr.bf16.mxu0 %v4403_v55  ;;  %3305 = vmatprep.subr.bf16.mxu1 %v4408_v7 }
 0x5b8   : > { %3275 = vmatpush1.bf16.msra.mxu0 %v4410_v47  ;;  %3307 = vmatpush1.bf16.msra.mxu1 %v4415_v57 }
 0x5b9   : > { %3277 = vmatprep.subr.bf16.mxu0 %v4423_v18  ;;  %3309 = vmatprep.subr.bf16.mxu1 %v4428_v31 }
 0x5bc   : > { %3279 = vmatpush1.bf16.msra.mxu0 %v4430_v34  ;;  %3311 = vmatpush1.bf16.msra.mxu1 %v4435_v44 }
 0x5bd   : > { %3281 = vmatprep.subr.bf16.mxu0 %v4442_v62  ;;  %3313 = vmatprep.subr.bf16.mxu1 %v4448_v17 }
 0x5c0   : > { %3283 = vmatpush1.bf16.msra.mxu0 %v4450_v22  ;;  %3315 = vmatpush1.bf16.msra.mxu1 %v4456_v49 }
 0x5c1   : > { %3285 = vmatprep.subr.bf16.mxu0 %v4462_v8  ;;  %3317 = vmatprep.subr.bf16.mxu1 %v4464_v12 }
 0x5c4   : > { %3287 = vmatpush1.bf16.msra.mxu0 %v4470_v25  ;;  %3319 = vmatpush1.bf16.msra.mxu1 %v4477_v58 }
 0x5c5   : > { %3289 = vmatprep.subr.bf16.mxu0 %v4479_v0  ;;  %3321 = vmatprep.subr.bf16.mxu1 %v4485_v46 }
 0x5c8   : > { %3291 = vmatpush1.bf16.msra.mxu0 %v4491_v24  ;;  %3323 = vmatpush1.bf16.msra.mxu1 %v4495_v27 }
 0x5c9   : > { %3325 = vmatprep.subr.bf16.mxu0 %v3324_v32  ;;  %3357 = vmatprep.subr.bf16.mxu1 %v3356_v50 }
 0x67e   : > { %v2039_v41 = vpop.f32.mrb[10].mxu0  ;;  %v2110_v61 = vpop.f32.mrb[10].mxu1 }
 0x67f   : > { %v3398_v42 = vadd.f32 %v2039_v41, %v4241_v43  ;;  %v2041_v53 = vpop.f32.mrb[11].mxu0  ;;  %v2112_v54 = vpop.f32.mrb[11].mxu1  ;;  %v3414_v37 = vadd.f32 %v2110_v61, %v4250_v3  ;;  %v2393_v41 = vld [vmem:[%s3912_s11 + $0x10] sm:$0xff] }
 0x680   : > { %v3399_v59 = vadd.f32 %v2041_v53, %v4243_v45  ;;  %v3415_v21 = vadd.f32 %v2112_v54, %v4247_v60  ;;  %v2397_v61 = vld [vmem:[%s3912_s11 + $0x30] sm:$0xff]  ;;  %v2404_v53 = vld [vmem:[%s3912_s11 + $0x68] sm:$0xff]  ;;  %v2402_v54 = vld [vmem:[%s3912_s11 + $0x58] sm:$0xff] }
 0x681   : > { %v2799_v51 = vmul.f32 -1.442695, %v3398_v42  ;;  %v2400_v42 = vld [vmem:[%s3912_s11 + $0x48] sm:$0xff] }
 0x682   : > { %v2800_v13 = vmul.f32 -1.442695, %v3399_v59  ;;  %v2801_v33 = vmul.f32 -1.442695, %v3415_v21  ;;  %v3328_v59 = vpack.c.bf16 %v2404_v53, %v2400_v42  ;;  %v2403_v21 = vld [vmem:[%s3912_s11 + $0x60] sm:$0xff] }
 0x683   : > { %3579 = vpow2.f32 %v2799_v51  ;;  %v2406_v51 = vld [vmem:[%s3912_s11 + $0x78] sm:$0xff] }
 0x684   : > { %3581 = vpow2.f32 %v2800_v13  ;;  %v2399_v13 = vld [vmem:[%s3912_s11 + $0x40] sm:$0xff] }
 0x685   : > { %3583 = vpow2.f32 %v2801_v33  ;;  %v3360_v33 = vpack.c.bf16 %v2406_v51, %v2402_v54 }
 0x686   : > { %3585 = vtanh.f32 %v3414_v37  ;;  %v3330_v37 = vpack.c.bf16 %v2403_v21, %v2399_v13 }
 0x68d   : > { %v3580_v40 = vpop.eup %3579 }
 0x68e   : > { %v3582_v48 = vpop.eup %3581  ;;  %v2122_v52 = vadd.f32 1.0, %v3580_v40  ;;  %v2401_v40 = vld [vmem:[%s3912_s11 + $0x50] sm:$0xff] }
 0x68f   : > { %v2128_v56 = vadd.f32 1.0, %v3582_v48  ;;  %v3584_v2 = vpop.eup %3583  ;;  %v2405_v48 = vld [vmem:[%s3912_s11 + $0x70] sm:$0xff] }
 0x690   : > { %3587 = vrcp.f32 %v2122_v52  ;;  %v3586_v6 = vpop.eup %3585  ;;  %v2135_v29 = vadd.f32 1.0, %v3584_v2  ;;  %v3362_v52 = vpack.c.bf16 %v2405_v48, %v2401_v40 }
 0x691   : > { %3589 = vrcp.f32 %v2128_v56 }
 0x692   : > { %3591 = vrcp.f32 %v2135_v29 }
 0x69a   : > { %v3588_v11 = vpop.eup %3587 }
 0x69b   : > { %v3590_v26 = vpop.eup %3589  ;;  %v2139_v30 = vmul.f32 %v3588_v11, %v3586_v6 }
 0x69c   : > { %v2138_v35 = vmul.f32 %v3590_v26, %v4549_v38  ;;  %v3592_v63 = vpop.eup %3591  ;;  %v2391_v38 = vld [vmem:[%s3912_s11] sm:$0xff] }
 0x69d   : > { %v3326_v10 = vpack.c.bf16 %v2395_v4, %v2391_v38 }
 0x69e   : > { %v4589_v39 = vadd.f32 %v2139_v30, %v2138_v35 }
 0x6a0   : > { %3593 = vtanh.f32 %v4589_v39 }
 0x6aa   : > { %v3594_v1 = vpop.eup %3593 }
 0x6ab   : > { %v2142_v5 = vmul.f32 %v3594_v1, %v3592_v63 }
 0x6ad   : > { %2144 = vst [vmem:[#allocation2 + $0x28] sm:$0xff] %v2142_v5  ;;  %2279 = vmatmul.mubr.f32.vlgmr.msra.gmra.mrb[12].mxu0 %v2142_v5  ;;  %2350 = vmatmul.mubr.f32.vlgmr.msra.gmra.mrb[12].mxu1 %v2142_v5 }
 0x6ae   : > { %2519 = vmatprep.mubr.f32.mxu0 %v3733_v15  ;;  %2590 = vmatprep.mubr.f32.mxu1 %v3733_v15  ;;  %v3358_v15 = vpack.c.bf16 %v2397_v61, %v2393_v41 }
 0x6af   : > { %3327 = vmatpush1.bf16.msra.mxu0 %v3326_v10 }
 0x6b0   : > { %3359 = vmatpush1.bf16.msra.mxu1 %v3358_v15  ;;  %3329 = vmatprep.subr.bf16.mxu0 %v3328_v59 }
 0x6b1   : > { %3361 = vmatprep.subr.bf16.mxu1 %v3360_v33 }
 0x6b3   : > { %3331 = vmatpush1.bf16.msra.mxu0 %v3330_v37 }
 0x6b4   : > { %3363 = vmatpush1.bf16.msra.mxu1 %v3362_v52  ;;  %3333 = vmatprep.subr.bf16.mxu0 %v4383_v9 }
 0x6b5   : > { %3365 = vmatprep.subr.bf16.mxu1 %v4388_v19 }
 0x6b7   : > { %3335 = vmatpush1.bf16.msra.mxu0 %v4390_v20 }
 0x6b8   : > { %3367 = vmatpush1.bf16.msra.mxu1 %v4395_v28  ;;  %3337 = vmatprep.subr.bf16.mxu0 %v4403_v55 }
 0x6b9   : > { %3369 = vmatprep.subr.bf16.mxu1 %v4408_v7 }
 0x6bb   : > { %3339 = vmatpush1.bf16.msra.mxu0 %v4410_v47 }
 0x6bc   : > { %3371 = vmatpush1.bf16.msra.mxu1 %v4415_v57  ;;  %3341 = vmatprep.subr.bf16.mxu0 %v4423_v18 }
 0x6bd   : > { %3373 = vmatprep.subr.bf16.mxu1 %v4428_v31 }
 0x6bf   : > { %3343 = vmatpush1.bf16.msra.mxu0 %v4430_v34 }
 0x6c0   : > { %3375 = vmatpush1.bf16.msra.mxu1 %v4435_v44  ;;  %3345 = vmatprep.subr.bf16.mxu0 %v4442_v62 }
 0x6c1   : > { %3377 = vmatprep.subr.bf16.mxu1 %v4448_v17 }
 0x6c3   : > { %3347 = vmatpush1.bf16.msra.mxu0 %v4450_v22 }
 0x6c4   : > { %3379 = vmatpush1.bf16.msra.mxu1 %v4456_v49  ;;  %3349 = vmatprep.subr.bf16.mxu0 %v4462_v8 }
 0x6c5   : > { %3381 = vmatprep.subr.bf16.mxu1 %v4464_v12 }
 0x6c7   : > { %3351 = vmatpush1.bf16.msra.mxu0 %v4470_v25 }
 0x6c8   : > { %3383 = vmatpush1.bf16.msra.mxu1 %v4477_v58  ;;  %3353 = vmatprep.subr.bf16.mxu0 %v4479_v0 }
 0x6c9   : > { %3385 = vmatprep.subr.bf16.mxu1 %v4485_v46 }
 0x6cb   : > { %3355 = vmatpush1.bf16.msra.mxu0 %v4491_v24 }
 0x6cc   : > { %3387 = vmatpush1.bf16.msra.mxu1 %v4495_v27 }
 0x780   : > { %v2280_v9 = vpop.f32.mrb[12].mxu0  ;;  %v2351_v19 = vpop.f32.mrb[12].mxu1 }
 0x781   : > { %v3400_v20 = vadd.f32 %v2280_v9, %v4241_v43  ;;  %v2282_v28 = vpop.f32.mrb[13].mxu0  ;;  %v2353_v55 = vpop.f32.mrb[13].mxu1  ;;  %v3416_v34 = vadd.f32 %v2351_v19, %v4250_v3 }
 0x782   : > { %v3401_v7 = vadd.f32 %v2282_v28, %v4243_v45  ;;  %v3417_v18 = vadd.f32 %v2353_v55, %v4247_v60 }
 0x783   : > { %v2802_v47 = vmul.f32 -1.442695, %v3400_v20 }
 0x784   : > { %v2803_v57 = vmul.f32 -1.442695, %v3401_v7  ;;  %v2804_v31 = vmul.f32 -1.442695, %v3417_v18 }
 0x785   : > { %3595 = vpow2.f32 %v2802_v47 }
 0x786   : > { %3597 = vpow2.f32 %v2803_v57 }
 0x787   : > { %3599 = vpow2.f32 %v2804_v31 }
 0x788   : > { %3601 = vtanh.f32 %v3416_v34 }
 0x78f   : > { %v3596_v44 = vpop.eup %3595 }
 0x790   : > { %v3598_v62 = vpop.eup %3597  ;;  %v2363_v17 = vadd.f32 1.0, %v3596_v44 }
 0x791   : > { %v2369_v22 = vadd.f32 1.0, %v3598_v62  ;;  %v3600_v49 = vpop.eup %3599 }
 0x792   : > { %3603 = vrcp.f32 %v2363_v17  ;;  %v3602_v8 = vpop.eup %3601  ;;  %v2376_v0 = vadd.f32 1.0, %v3600_v49 }
 0x793   : > { %3605 = vrcp.f32 %v2369_v22 }
 0x794   : > { %3607 = vrcp.f32 %v2376_v0 }
 0x79c   : > { %v3604_v12 = vpop.eup %3603 }
 0x79d   : > { %v3606_v25 = vpop.eup %3605  ;;  %v2380_v58 = vmul.f32 %v3604_v12, %v3602_v8 }
 0x79e   : > { %v2379_v46 = vmul.f32 %v3606_v25, %v4589_v39  ;;  %v3608_v27 = vpop.eup %3607 }
 0x7a0   : > { %v2381_v24 = vadd.f32 %v2380_v58, %v2379_v46 }
 0x7a2   : > { %3609 = vtanh.f32 %v2381_v24 }
 0x7ac   : > { %v3610_v56 = vpop.eup %3609 }
 0x7ad   : > { %v2383_v2 = vmul.f32 %v3610_v56, %v3608_v27 }
 0x7af   : > { %2385 = vst [vmem:[#allocation2 + $0x30] sm:$0xff] %v2383_v2  ;;  %2520 = vmatmul.mubr.f32.vlgmr.msra.gmra.mrb[14].mxu0 %v2383_v2  ;;  %2591 = vmatmul.mubr.f32.vlgmr.msra.gmra.mrb[14].mxu1 %v2383_v2 }
 0x882   : > { %v2521_v6 = vpop.f32.mrb[14].mxu0  ;;  %v2592_v11 = vpop.f32.mrb[14].mxu1 }
 0x883   : > { %v3402_v26 = vadd.f32 %v2521_v6, %v4241_v43  ;;  %v2523_v30 = vpop.f32.mrb[15].mxu0  ;;  %v2594_v29 = vpop.f32.mrb[15].mxu1  ;;  %v3418_v14 = vadd.f32 %v2592_v11, %v4250_v3 }
 0x884   : > { %v3403_v35 = vadd.f32 %v2523_v30, %v4243_v45  ;;  %v3419_v39 = vadd.f32 %v2594_v29, %v4247_v60 }
 0x885   : > { %v2805_v63 = vmul.f32 -1.442695, %v3402_v26 }
 0x886   : > { %v2806_v1 = vmul.f32 -1.442695, %v3403_v35  ;;  %v2807_v5 = vmul.f32 -1.442695, %v3419_v39 }
 0x887   : > { %3611 = vpow2.f32 %v2805_v63 }
 0x888   : > { %3613 = vpow2.f32 %v2806_v1 }
 0x889   : > { %3615 = vpow2.f32 %v2807_v5 }
 0x88a   : > { %3617 = vtanh.f32 %v3418_v14 }
 0x891   : > { %v3612_v16 = vpop.eup %3611 }
 0x892   : > { %v3614_v23 = vpop.eup %3613  ;;  %v2604_v32 = vadd.f32 1.0, %v3612_v16 }
 0x893   : > { %v2610_v43 = vadd.f32 1.0, %v3614_v23  ;;  %v3616_v45 = vpop.eup %3615 }
 0x894   : > { %3619 = vrcp.f32 %v2604_v32  ;;  %v3618_v36 = vpop.eup %3617  ;;  %v2617_v10 = vadd.f32 1.0, %v3616_v45 }
 0x895   : > { %3621 = vrcp.f32 %v2610_v43 }
 0x896   : > { %3623 = vrcp.f32 %v2617_v10 }
 0x89e   : > { %v3620_v38 = vpop.eup %3619 }
 0x89f   : > { %v3622_v4 = vpop.eup %3621  ;;  %v2621_v50 = vmul.f32 %v3620_v38, %v3618_v36 }
 0x8a0   : > { %v2620_v60 = vmul.f32 %v3622_v4, %v2381_v24  ;;  %v3624_v3 = vpop.eup %3623 }
 0x8a2   : > { %v2622_v41 = vadd.f32 %v2621_v50, %v2620_v60 }
 0x8a4   : > { %3625 = vtanh.f32 %v2622_v41  ;;  %2628 = vst [vmem:[%s3933_s27] sm:$0xff] %v2622_v41 }
 0x8ae   : > { %v3626_v61 = vpop.eup %3625 }
 0x8af   : > { %v2624_v15 = vmul.f32 %v3626_v61, %v3624_v3 }
 0x8b1   : > { %2626 = vst [vmem:[#allocation2 + $0x38] sm:$0xff] %v2624_v15  ;;  %2627 = vst [vmem:[%s3928_s6] sm:$0xff] %v2624_v15 }
 0x8b2 PF: > { %p19_p3 = scmp.ge.s32.totalorder %s3786_s23, 4   ;;  %s4670_s18 = smov %s3719_s19 }
 0x8b3   : > { %s4671_s19 = smov %s3723_s20  ;;  %s4672_s20 = smov %s3796_s26 }
 0x8b4   : > { %s4673_s21 = smov %s3786_s23  ;;  %21 = sbr.rel (!%p19_p3) target bundleno = 5 (0x5), region = 161 }
 0x8bb   :  { %2662 = vsyncpa [#allocation5], 1 }
 0x8bc   :  { %2664 = vsyncpa [#allocation5 + $0x1], 1 }
 0x8bd   :  { %2665 = vsyncpa [#allocation7], 1 }
 0x8be   :  { %2667 = vsyncpa [#allocation7 + $0x1], 1 }

</bundles_post_ra>
